<compile_context>
chip_gen: v5e
topology: v5e:2x2
jax: 0.10.0
libtpu: 0.0.40
codegen_flags: <defaults>
</compile_context>

<pallas_src>
import math
import functools

import jax
import jax.numpy as jnp
from jax.experimental import pallas as pl
from jax.experimental.pallas import tpu as pltpu


# ----------------------------- Pallas kernels ------------------------------

def _mha_ln_kernel(xq_ref, xkv_ref, rowm_ref, colm_ref,
                   wqkv_ref, bqkv_ref, wo_ref, bo_ref, g_ref, beta_ref,
                   o_ref, *, heads, inv_scale, causal, self_attn, eps):
    """One (batch) grid step: fused QKV proj + multi-head attention +
    output projection + residual add + LayerNorm."""
    xq = xq_ref[0].astype(jnp.float32)                    # (Sq, D)
    Sq, D = xq.shape
    dh = D // heads

    if self_attn:
        # Single fused (Sq, D) @ (D, 3D) projection.
        qkv = (jnp.dot(xq, wqkv_ref[...], preferred_element_type=jnp.float32)
               + bqkv_ref[...])
        q = qkv[:, :D]
        k = qkv[:, D:2 * D]
        v = qkv[:, 2 * D:]
        Sk = Sq
    else:
        xkv = xkv_ref[0].astype(jnp.float32)              # (Sk, D)
        Sk = xkv.shape[0]
        q = (jnp.dot(xq, wqkv_ref[:, :D], preferred_element_type=jnp.float32)
             + bqkv_ref[:, :D])
        kv = (jnp.dot(xkv, wqkv_ref[:, D:], preferred_element_type=jnp.float32)
              + bqkv_ref[:, D:])                          # fused K|V projection
        k = kv[:, :D]
        v = kv[:, D:]

    # Mask built in-kernel from tiny pad-mask vectors (no (B,H,Sq,Sk) HBM array).
    rm = rowm_ref[0]                                      # (Sq, 1)  query keep
    cm = colm_ref[0]                                      # (1, Sk)  key   keep
    keep = (rm > 0.5) & (cm > 0.5)                        # (Sq, Sk)
    if causal:
        qi = jax.lax.broadcasted_iota(jnp.int32, (Sq, Sk), 0)
        ki = jax.lax.broadcasted_iota(jnp.int32, (Sq, Sk), 1)
        keep = keep & (ki <= qi)

    # All heads of this batch handled in this grid step (static unroll over H).
    out = jnp.zeros((Sq, D), jnp.float32)
    for h in range(heads):
        lo = h * dh
        q_h = q[:, lo:lo + dh]
        k_h = k[:, lo:lo + dh]
        v_h = v[:, lo:lo + dh]
        # energy = Q K^T * (1/scale)   (scale folded into a multiply)
        s = jax.lax.dot_general(q_h, k_h, (((1,), (1,)), ((), ())),
                                preferred_element_type=jnp.float32) * inv_scale
        s = jnp.where(keep, s, -1e10)                     # masked_fill(mask==0)
        s = s - jnp.max(s, axis=-1, keepdims=True)
        p = jnp.exp(s)
        a = p * pl.reciprocal(jnp.sum(p, axis=-1, keepdims=True), approx=True)
        ctx = jnp.dot(a, v_h, preferred_element_type=jnp.float32)   # (Sq, dh)
        # Accumulate the output projection per head (== concat(heads) @ Wo).
        out = out + jnp.dot(ctx, wo_ref[lo:lo + dh, :],
                            preferred_element_type=jnp.float32)
    out = out + bo_ref[...]

    # Fused residual add + LayerNorm epilogue.
    s = xq + out
    mean = jnp.mean(s, axis=-1, keepdims=True)
    var = jnp.mean((s - mean) ** 2, axis=-1, keepdims=True)
    n = (s - mean) * jax.lax.rsqrt(var + eps)
    o_ref[0] = (n * g_ref[...] + beta_ref[...]).astype(o_ref.dtype)


def fused_mha(p, xq, xkv, rowm, colm, gamma, beta, *, heads, causal,
              self_attn, eps=1e-5):
    """xq: (B,Sq,D) queries (also the residual stream), xkv: (B,Sk,D) keys/values,
    rowm: (B,Sq,1) query keep-mask, colm: (B,1,Sk) key keep-mask."""
    B, Sq, D = xq.shape
    Sk = xkv.shape[1]
    inv_scale = 1.0 / math.sqrt(D // heads)
    kernel = functools.partial(_mha_ln_kernel, heads=heads, inv_scale=inv_scale,
                               causal=causal, self_attn=self_attn, eps=eps)
    return pl.pallas_call(
        kernel,
        out_shape=jax.ShapeDtypeStruct((B, Sq, D), xq.dtype),
        grid=(B,),
        in_specs=[
            pl.BlockSpec((1, Sq, D), lambda b: (b, 0, 0)),   # xq
            pl.BlockSpec((1, Sk, D), lambda b: (b, 0, 0)),   # xkv
            pl.BlockSpec((1, Sq, 1), lambda b: (b, 0, 0)),   # row keep-mask
            pl.BlockSpec((1, 1, Sk), lambda b: (b, 0, 0)),   # col keep-mask
            pl.BlockSpec((D, 3 * D), lambda b: (0, 0)),      # wqkv (fused)
            pl.BlockSpec((1, 3 * D), lambda b: (0, 0)),      # bqkv
            pl.BlockSpec((D, D), lambda b: (0, 0)),          # wo
            pl.BlockSpec((1, D), lambda b: (0, 0)),          # bo
            pl.BlockSpec((1, D), lambda b: (0, 0)),          # ln gamma
            pl.BlockSpec((1, D), lambda b: (0, 0)),          # ln beta
        ],
        out_specs=pl.BlockSpec((1, Sq, D), lambda b: (b, 0, 0)),
        compiler_params=pltpu.CompilerParams(
            dimension_semantics=("parallel",)),
    )(xq, xkv, rowm, colm,
      p["wqkv"], p["bqkv"].reshape(1, 3 * D),
      p["wo"], p["bo"].reshape(1, D),
      gamma.reshape(1, D), beta.reshape(1, D))


def _ffn_ln_kernel(x_ref, w1_ref, b1_ref, w2_ref, b2_ref, g_ref, beta_ref,
                   o_ref, *, eps):
    """Fused position-wise FF (w1 + ReLU + w2) + residual add + LayerNorm."""
    x = x_ref[...].astype(jnp.float32)                    # (tm, D)
    h = jnp.maximum(
        jnp.dot(x, w1_ref[...], preferred_element_type=jnp.float32) + b1_ref[...],
        0.0)
    y = jnp.dot(h, w2_ref[...], preferred_element_type=jnp.float32) + b2_ref[...]
    s = x + y                                             # residual add
    mean = jnp.mean(s, axis=-1, keepdims=True)
    var = jnp.mean((s - mean) ** 2, axis=-1, keepdims=True)
    n = (s - mean) * jax.lax.rsqrt(var + eps)
    o_ref[...] = (n * g_ref[...] + beta_ref[...]).astype(o_ref.dtype)


def ffn_ln(x, w1, b1, w2, b2, gamma, beta, *, eps=1e-5, tm=256):
    M, D = x.shape
    Pf = w1.shape[1]
    tm = min(tm, M)
    return pl.pallas_call(
        functools.partial(_ffn_ln_kernel, eps=eps),
        out_shape=jax.ShapeDtypeStruct((M, D), x.dtype),
        grid=(pl.cdiv(M, tm),),
        in_specs=[pl.BlockSpec((tm, D), lambda i: (i, 0)),
                  pl.BlockSpec((D, Pf), lambda i: (0, 0)),
                  pl.BlockSpec((1, Pf), lambda i: (0, 0)),
                  pl.BlockSpec((Pf, D), lambda i: (0, 0)),
                  pl.BlockSpec((1, D), lambda i: (0, 0)),
                  pl.BlockSpec((1, D), lambda i: (0, 0)),
                  pl.BlockSpec((1, D), lambda i: (0, 0))],
        out_specs=pl.BlockSpec((tm, D), lambda i: (i, 0)),
        compiler_params=pltpu.CompilerParams(
            dimension_semantics=("parallel",)),
    )(x, w1, b1.reshape(1, Pf), w2, b2.reshape(1, D),
      gamma.reshape(1, D), beta.reshape(1, D))


def _linear_kernel(x_ref, w_ref, b_ref, o_ref):
    y = jnp.dot(x_ref[...], w_ref[...], preferred_element_type=jnp.float32)
    o_ref[...] = (y + b_ref[...]).astype(o_ref.dtype)


def linear(x, w, b, *, tm=256, tn=512):
    """Tiled (M-tile, N-tile) linear: x (M,Din) @ w (Din,Dout) + b."""
    M, Din = x.shape
    Dout = w.shape[1]
    tm = min(tm, M)
    tn = min(tn, Dout)
    return pl.pallas_call(
        _linear_kernel,
        out_shape=jax.ShapeDtypeStruct((M, Dout), x.dtype),
        grid=(pl.cdiv(M, tm), pl.cdiv(Dout, tn)),
        in_specs=[pl.BlockSpec((tm, Din), lambda i, j: (i, 0)),
                  pl.BlockSpec((Din, tn), lambda i, j: (0, j)),
                  pl.BlockSpec((1, tn), lambda i, j: (0, j))],
        out_specs=pl.BlockSpec((tm, tn), lambda i, j: (i, j)),
        compiler_params=pltpu.CompilerParams(
            dimension_semantics=("parallel", "parallel")),
    )(x, w, b.reshape(1, Dout))


# ------------------------------ Model (glue) --------------------------------

def decoder_layer(p, x_trg, x_src, trg_keep, src_keep, heads):
    B, St, D = x_trg.shape
    Ss = x_src.shape[1]
    ones_row = jnp.ones((B, St, 1), jnp.float32)
    ones_col = jnp.ones((B, 1, St), jnp.float32)
    # self-attention (causal + target-row pad mask) + residual + LN  [1 kernel]
    x = fused_mha(p["self_attn"], x_trg, x_trg,
                  trg_keep.reshape(B, St, 1), ones_col,
                  p["ln_g"], p["ln_b"],
                  heads=heads, causal=True, self_attn=True)
    # cross-attention (source-key pad mask) + residual + LN          [1 kernel]
    x = fused_mha(p["src_attn"], x, x_src,
                  ones_row, src_keep.reshape(B, 1, Ss),
                  p["ln_g"], p["ln_b"],
                  heads=heads, causal=False, self_attn=False)
    # feed-forward + residual + LN                                   [1 kernel]
    x = ffn_ln(x.reshape(B * St, D), p["ff_w1"], p["ff_b1"],
               p["ff_w2"], p["ff_b2"], p["ln_g"], p["ln_b"]).reshape(B, St, D)
    return x


def positional_embedding(max_len, d_model):
    position = jnp.arange(0.0, max_len)[:, None]
    div_term = jnp.exp(jnp.arange(0.0, d_model, 2) * -(math.log(10000.0) / d_model))
    pe = jnp.zeros((max_len, d_model), jnp.float32)
    pe = pe.at[:, 0::2].set(jnp.sin(position * div_term))
    pe = pe.at[:, 1::2].set(jnp.cos(position * div_term))
    return pe


def decoder_forward(params, src_tokens, trg_tokens, encoder_out, *, heads, pad_id):
    B, St = trg_tokens.shape
    D = params["embed_tokens"].shape[1]
    # Tiny (B,S) keep masks only; causal part is built inside the kernel.
    src_keep = (src_tokens != pad_id).astype(jnp.float32)       # (B, Ss)
    trg_keep = (trg_tokens != pad_id).astype(jnp.float32)       # (B, St)
    # TODO(synk): token-embedding gather stays in XLA (data-dependent gather).
    x = params["embed_tokens"][trg_tokens] * math.sqrt(D)
    x = x + params["pos_embed"][None, :St, :]
    h = x                                                       # dropout = identity (eval)
    for lp in params["layers"]:
        h = decoder_layer(lp, h, encoder_out, trg_keep, src_keep, heads)
    logits = linear(h.reshape(B * St, D), params["out_w"], params["out_b"])
    return logits, h


# ------------------------------ Param init ----------------------------------

def _dense(key, din, dout):
    k1, k2 = jax.random.split(key)
    w = jax.random.normal(k1, (din, dout), jnp.float32) / math.sqrt(din)
    b = jax.random.normal(k2, (dout,), jnp.float32) * 0.01
    return w, b


def init_params(key, vocab, D, layers, heads, pf_dim, max_positions):
    keys = jax.random.split(key, 2 + layers)
    params = {
        "embed_tokens": jax.random.normal(keys[0], (vocab, D), jnp.float32) * 0.1,
        "pos_embed": positional_embedding(max_positions, D),
        "layers": [],
    }
    params["out_w"], params["out_b"] = _dense(keys[1], D, vocab)

    def attn_params(k):
        k1, k2 = jax.random.split(k)
        wqkv, bqkv = _dense(k1, D, 3 * D)          # fused q|k|v weights
        wo, bo = _dense(k2, D, D)
        return {"wqkv": wqkv, "bqkv": bqkv, "wo": wo, "bo": bo}

    for li in range(layers):
        ks = jax.random.split(keys[2 + li], 4)
        w1, b1 = _dense(ks[2], D, pf_dim)
        w2, b2 = _dense(ks[3], pf_dim, D)
        params["layers"].append({
            "ln_g": jnp.ones((D,), jnp.float32),   # single LayerNorm per layer
            "ln_b": jnp.zeros((D,), jnp.float32),  # (shared across the 3 uses)
            "self_attn": attn_params(ks[0]),
            "src_attn": attn_params(ks[1]),
            "ff_w1": w1, "ff_b1": b1,
            "ff_w2": w2, "ff_b2": b2,
        })
    return params


# --------------------------------- Main --------------------------------------

if __name__ == "__main__":
    B = 2                # batch
    S_SRC = 8            # source sequence length
    S_TRG = 8            # target sequence length
    D = 32               # embed_dim
    HEADS = 4
    PF_DIM = 64
    LAYERS = 2
    VOCAB = 50
    PAD_ID = 1
    MAX_POS = 64

    key = jax.random.PRNGKey(0)
    k_tok_s, k_tok_t, k_enc, k_par = jax.random.split(key, 4)

    src_tokens = jax.random.randint(k_tok_s, (B, S_SRC), 2, VOCAB, dtype=jnp.int32)
    trg_tokens = jax.random.randint(k_tok_t, (B, S_TRG), 2, VOCAB, dtype=jnp.int32)
    # add some padding to exercise the masks
    src_tokens = src_tokens.at[0, -2:].set(PAD_ID)
    trg_tokens = trg_tokens.at[1, -1:].set(PAD_ID)

    encoder_out = jax.random.normal(k_enc, (B, S_SRC, D), jnp.float32)
    params = init_params(k_par, VOCAB, D, LAYERS, HEADS, PF_DIM, MAX_POS)

    fwd = jax.jit(functools.partial(decoder_forward, heads=HEADS, pad_id=PAD_ID))
    logits, h = fwd(params, src_tokens, trg_tokens, encoder_out)
    jax.block_until_ready((logits, h))

    assert logits.shape == (B * S_TRG, VOCAB)
    assert h.shape == (B, S_TRG, D)
    assert bool(jnp.all(jnp.isfinite(logits))) and bool(jnp.all(jnp.isfinite(h)))
    print("KERNEL_OK")
</pallas_src>

<mosaic_0001>
module attributes {stable_mosaic.version = 11 : i64} {
  func.func @_mha_ln_kernel(%arg0: i32, %arg1: memref<1x8x32xf32, #tpu.memory_space<vmem>>, %arg2: memref<1x8x32xf32, #tpu.memory_space<vmem>>, %arg3: memref<1x8x1xf32, #tpu.memory_space<vmem>>, %arg4: memref<1x1x8xf32, #tpu.memory_space<vmem>>, %arg5: memref<32x96xf32, #tpu.memory_space<vmem>>, %arg6: memref<1x96xf32, #tpu.memory_space<vmem>>, %arg7: memref<32x32xf32, #tpu.memory_space<vmem>>, %arg8: memref<1x32xf32, #tpu.memory_space<vmem>>, %arg9: memref<1x32xf32, #tpu.memory_space<vmem>>, %arg10: memref<1x32xf32, #tpu.memory_space<vmem>>, %arg11: memref<1x8x32xf32, #tpu.memory_space<vmem>>) attributes {dimension_semantics = [#tpu.dimension_semantics<parallel>], iteration_bounds = array<i64: 2>, scalar_prefetch = 0 : i64, scratch_operands = 0 : i64, tpu.core_type = #tpu.core_type<tc>, window_params = [{transform_indices = @transform_0, window_bounds = array<i64: 1, 8, 32>}, {transform_indices = @transform_1, window_bounds = array<i64: 1, 8, 32>}, {transform_indices = @transform_2, window_bounds = array<i64: 1, 8, 1>}, {transform_indices = @transform_3, window_bounds = array<i64: 1, 1, 8>}, {pipeline_mode = #tpu.pipeline_mode<synchronous>, transform_indices = @transform_4, window_bounds = array<i64: 32, 96>}, {pipeline_mode = #tpu.pipeline_mode<synchronous>, transform_indices = @transform_5, window_bounds = array<i64: 1, 96>}, {pipeline_mode = #tpu.pipeline_mode<synchronous>, transform_indices = @transform_6, window_bounds = array<i64: 32, 32>}, {pipeline_mode = #tpu.pipeline_mode<synchronous>, transform_indices = @transform_7, window_bounds = array<i64: 1, 32>}, {pipeline_mode = #tpu.pipeline_mode<synchronous>, transform_indices = @transform_8, window_bounds = array<i64: 1, 32>}, {pipeline_mode = #tpu.pipeline_mode<synchronous>, transform_indices = @transform_9, window_bounds = array<i64: 1, 32>}, {transform_indices = @transform_10, window_bounds = array<i64: 1, 8, 32>}]} {
    %c0 = arith.constant 0 : index
    %c0_0 = arith.constant 0 : index
    %c0_1 = arith.constant 0 : index
    %0 = vector.load %arg1[%c0, %c0_0, %c0_1] : memref<1x8x32xf32, #tpu.memory_space<vmem>>, vector<1x8x32xf32>
    %1 = vector.shape_cast %0 : vector<1x8x32xf32> to vector<8x32xf32>
    %c0_2 = arith.constant 0 : index
    %c0_3 = arith.constant 0 : index
    %2 = vector.load %arg5[%c0_2, %c0_3] : memref<32x96xf32, #tpu.memory_space<vmem>>, vector<32x96xf32>
    %cst = arith.constant dense<0.000000e+00> : vector<8x96xf32>
    %3 = tpu.matmul %1, %2, %cst {dimension_numbers = #tpu.dot_dimension_numbers<[1], [0], [0], [1], [0, 0, 1, 1], [], []>} : vector<8x32xf32>, vector<32x96xf32>, vector<8x96xf32> -> vector<8x96xf32>
    %c0_4 = arith.constant 0 : index
    %c0_5 = arith.constant 0 : index
    %4 = vector.load %arg6[%c0_4, %c0_5] : memref<1x96xf32, #tpu.memory_space<vmem>>, vector<1x96xf32>
    %5 = vector.broadcast %4 : vector<1x96xf32> to vector<8x96xf32>
    %6 = arith.addf %3, %5 : vector<8x96xf32>
    %7 = vector.extract_strided_slice %6 {offsets = [0, 0], sizes = [8, 32], strides = [1, 1]} : vector<8x96xf32> to vector<8x32xf32>
    %8 = vector.extract_strided_slice %6 {offsets = [0, 32], sizes = [8, 32], strides = [1, 1]} : vector<8x96xf32> to vector<8x32xf32>
    %9 = vector.extract_strided_slice %6 {offsets = [0, 64], sizes = [8, 32], strides = [1, 1]} : vector<8x96xf32> to vector<8x32xf32>
    %c0_6 = arith.constant 0 : index
    %c0_7 = arith.constant 0 : index
    %c0_8 = arith.constant 0 : index
    %10 = vector.load %arg3[%c0_6, %c0_7, %c0_8] : memref<1x8x1xf32, #tpu.memory_space<vmem>>, vector<1x8x1xf32>
    %11 = vector.shape_cast %10 : vector<1x8x1xf32> to vector<8x1xf32>
    %c0_9 = arith.constant 0 : index
    %c0_10 = arith.constant 0 : index
    %c0_11 = arith.constant 0 : index
    %12 = vector.load %arg4[%c0_9, %c0_10, %c0_11] : memref<1x1x8xf32, #tpu.memory_space<vmem>>, vector<1x1x8xf32>
    %13 = vector.shape_cast %12 : vector<1x1x8xf32> to vector<1x8xf32>
    %cst_12 = arith.constant 5.000000e-01 : f32
    %14 = vector.broadcast %cst_12 : f32 to vector<8x1xf32>
    %15 = arith.cmpf ogt, %11, %14 : vector<8x1xf32>
    %cst_13 = arith.constant 5.000000e-01 : f32
    %16 = vector.broadcast %cst_13 : f32 to vector<1x8xf32>
    %17 = arith.cmpf ogt, %13, %16 : vector<1x8xf32>
    %18 = vector.broadcast %15 : vector<8x1xi1> to vector<8x8xi1>
    %19 = vector.broadcast %17 : vector<1x8xi1> to vector<8x8xi1>
    %20 = arith.andi %18, %19 : vector<8x8xi1>
    %21 = tpu.iota {dimensions = array<i32: 0>} : vector<8x8xi32>
    %22 = tpu.iota {dimensions = array<i32: 1>} : vector<8x8xi32>
    %23 = arith.cmpi sle, %22, %21 : vector<8x8xi32>
    %24 = arith.andi %20, %23 : vector<8x8xi1>
    %cst_14 = arith.constant 0.000000e+00 : f32
    %25 = vector.broadcast %cst_14 : f32 to vector<8x32xf32>
    %26 = vector.extract_strided_slice %7 {offsets = [0, 0], sizes = [8, 8], strides = [1, 1]} : vector<8x32xf32> to vector<8x8xf32>
    %27 = vector.extract_strided_slice %8 {offsets = [0, 0], sizes = [8, 8], strides = [1, 1]} : vector<8x32xf32> to vector<8x8xf32>
    %28 = vector.extract_strided_slice %9 {offsets = [0, 0], sizes = [8, 8], strides = [1, 1]} : vector<8x32xf32> to vector<8x8xf32>
    %cst_15 = arith.constant dense<0.000000e+00> : vector<8x8xf32>
    %29 = tpu.matmul %26, %27, %cst_15 {dimension_numbers = #tpu.dot_dimension_numbers<[1], [1], [0], [0], [0, 0, 1, 0], [], []>} : vector<8x8xf32>, vector<8x8xf32>, vector<8x8xf32> -> vector<8x8xf32>
    %cst_16 = arith.constant 0.353553385 : f32
    %30 = vector.broadcast %cst_16 : f32 to vector<8x8xf32>
    %31 = arith.mulf %29, %30 : vector<8x8xf32>
    %cst_17 = arith.constant -1.000000e+10 : f32
    %32 = vector.broadcast %cst_17 : f32 to vector<8x8xf32>
    %33 = arith.select %24, %31, %32 : vector<8x8xi1>, vector<8x8xf32>
    %cst_18 = arith.constant dense<0xFF800000> : vector<8xf32>
    %34 = vector.multi_reduction <maximumf>, %33, %cst_18 [1] : vector<8x8xf32> to vector<8xf32>
    %35 = vector.shape_cast %34 : vector<8xf32> to vector<8x1xf32>
    %36 = vector.broadcast %35 : vector<8x1xf32> to vector<8x8xf32>
    %37 = arith.subf %33, %36 : vector<8x8xf32>
    %38 = math.exp %37 : vector<8x8xf32>
    %cst_19 = arith.constant dense<0.000000e+00> : vector<8xf32>
    %39 = vector.multi_reduction <add>, %38, %cst_19 [1] : vector<8x8xf32> to vector<8xf32>
    %40 = vector.shape_cast %39 : vector<8xf32> to vector<8x1xf32>
    %41 = tpu.reciprocal %40 {approx = true} : vector<8x1xf32> -> vector<8x1xf32>
    %42 = vector.broadcast %41 : vector<8x1xf32> to vector<8x8xf32>
    %43 = arith.mulf %38, %42 : vector<8x8xf32>
    %cst_20 = arith.constant dense<0.000000e+00> : vector<8x8xf32>
    %44 = tpu.matmul %43, %28, %cst_20 {dimension_numbers = #tpu.dot_dimension_numbers<[1], [0], [0], [1], [0, 0, 1, 1], [], []>} : vector<8x8xf32>, vector<8x8xf32>, vector<8x8xf32> -> vector<8x8xf32>
    %c0_21 = arith.constant 0 : index
    %c0_22 = arith.constant 0 : index
    %45 = vector.load %arg7[%c0_21, %c0_22] : memref<32x32xf32, #tpu.memory_space<vmem>>, vector<8x32xf32>
    %cst_23 = arith.constant dense<0.000000e+00> : vector<8x32xf32>
    %46 = tpu.matmul %44, %45, %cst_23 {dimension_numbers = #tpu.dot_dimension_numbers<[1], [0], [0], [1], [0, 0, 1, 1], [], []>} : vector<8x8xf32>, vector<8x32xf32>, vector<8x32xf32> -> vector<8x32xf32>
    %47 = arith.addf %25, %46 : vector<8x32xf32>
    %48 = vector.extract_strided_slice %7 {offsets = [0, 8], sizes = [8, 8], strides = [1, 1]} : vector<8x32xf32> to vector<8x8xf32>
    %49 = vector.extract_strided_slice %8 {offsets = [0, 8], sizes = [8, 8], strides = [1, 1]} : vector<8x32xf32> to vector<8x8xf32>
    %50 = vector.extract_strided_slice %9 {offsets = [0, 8], sizes = [8, 8], strides = [1, 1]} : vector<8x32xf32> to vector<8x8xf32>
    %cst_24 = arith.constant dense<0.000000e+00> : vector<8x8xf32>
    %51 = tpu.matmul %48, %49, %cst_24 {dimension_numbers = #tpu.dot_dimension_numbers<[1], [1], [0], [0], [0, 0, 1, 0], [], []>} : vector<8x8xf32>, vector<8x8xf32>, vector<8x8xf32> -> vector<8x8xf32>
    %cst_25 = arith.constant 0.353553385 : f32
    %52 = vector.broadcast %cst_25 : f32 to vector<8x8xf32>
    %53 = arith.mulf %51, %52 : vector<8x8xf32>
    %cst_26 = arith.constant -1.000000e+10 : f32
    %54 = vector.broadcast %cst_26 : f32 to vector<8x8xf32>
    %55 = arith.select %24, %53, %54 : vector<8x8xi1>, vector<8x8xf32>
    %cst_27 = arith.constant dense<0xFF800000> : vector<8xf32>
    %56 = vector.multi_reduction <maximumf>, %55, %cst_27 [1] : vector<8x8xf32> to vector<8xf32>
    %57 = vector.shape_cast %56 : vector<8xf32> to vector<8x1xf32>
    %58 = vector.broadcast %57 : vector<8x1xf32> to vector<8x8xf32>
    %59 = arith.subf %55, %58 : vector<8x8xf32>
    %60 = math.exp %59 : vector<8x8xf32>
    %cst_28 = arith.constant dense<0.000000e+00> : vector<8xf32>
    %61 = vector.multi_reduction <add>, %60, %cst_28 [1] : vector<8x8xf32> to vector<8xf32>
    %62 = vector.shape_cast %61 : vector<8xf32> to vector<8x1xf32>
    %63 = tpu.reciprocal %62 {approx = true} : vector<8x1xf32> -> vector<8x1xf32>
    %64 = vector.broadcast %63 : vector<8x1xf32> to vector<8x8xf32>
    %65 = arith.mulf %60, %64 : vector<8x8xf32>
    %cst_29 = arith.constant dense<0.000000e+00> : vector<8x8xf32>
    %66 = tpu.matmul %65, %50, %cst_29 {dimension_numbers = #tpu.dot_dimension_numbers<[1], [0], [0], [1], [0, 0, 1, 1], [], []>} : vector<8x8xf32>, vector<8x8xf32>, vector<8x8xf32> -> vector<8x8xf32>
    %c8 = arith.constant 8 : index
    %c0_30 = arith.constant 0 : index
    %67 = vector.load %arg7[%c8, %c0_30] : memref<32x32xf32, #tpu.memory_space<vmem>>, vector<8x32xf32>
    %cst_31 = arith.constant dense<0.000000e+00> : vector<8x32xf32>
    %68 = tpu.matmul %66, %67, %cst_31 {dimension_numbers = #tpu.dot_dimension_numbers<[1], [0], [0], [1], [0, 0, 1, 1], [], []>} : vector<8x8xf32>, vector<8x32xf32>, vector<8x32xf32> -> vector<8x32xf32>
    %69 = arith.addf %47, %68 : vector<8x32xf32>
    %70 = vector.extract_strided_slice %7 {offsets = [0, 16], sizes = [8, 8], strides = [1, 1]} : vector<8x32xf32> to vector<8x8xf32>
    %71 = vector.extract_strided_slice %8 {offsets = [0, 16], sizes = [8, 8], strides = [1, 1]} : vector<8x32xf32> to vector<8x8xf32>
    %72 = vector.extract_strided_slice %9 {offsets = [0, 16], sizes = [8, 8], strides = [1, 1]} : vector<8x32xf32> to vector<8x8xf32>
    %cst_32 = arith.constant dense<0.000000e+00> : vector<8x8xf32>
    %73 = tpu.matmul %70, %71, %cst_32 {dimension_numbers = #tpu.dot_dimension_numbers<[1], [1], [0], [0], [0, 0, 1, 0], [], []>} : vector<8x8xf32>, vector<8x8xf32>, vector<8x8xf32> -> vector<8x8xf32>
    %cst_33 = arith.constant 0.353553385 : f32
    %74 = vector.broadcast %cst_33 : f32 to vector<8x8xf32>
    %75 = arith.mulf %73, %74 : vector<8x8xf32>
    %cst_34 = arith.constant -1.000000e+10 : f32
    %76 = vector.broadcast %cst_34 : f32 to vector<8x8xf32>
    %77 = arith.select %24, %75, %76 : vector<8x8xi1>, vector<8x8xf32>
    %cst_35 = arith.constant dense<0xFF800000> : vector<8xf32>
    %78 = vector.multi_reduction <maximumf>, %77, %cst_35 [1] : vector<8x8xf32> to vector<8xf32>
    %79 = vector.shape_cast %78 : vector<8xf32> to vector<8x1xf32>
    %80 = vector.broadcast %79 : vector<8x1xf32> to vector<8x8xf32>
    %81 = arith.subf %77, %80 : vector<8x8xf32>
    %82 = math.exp %81 : vector<8x8xf32>
    %cst_36 = arith.constant dense<0.000000e+00> : vector<8xf32>
    %83 = vector.multi_reduction <add>, %82, %cst_36 [1] : vector<8x8xf32> to vector<8xf32>
    %84 = vector.shape_cast %83 : vector<8xf32> to vector<8x1xf32>
    %85 = tpu.reciprocal %84 {approx = true} : vector<8x1xf32> -> vector<8x1xf32>
    %86 = vector.broadcast %85 : vector<8x1xf32> to vector<8x8xf32>
    %87 = arith.mulf %82, %86 : vector<8x8xf32>
    %cst_37 = arith.constant dense<0.000000e+00> : vector<8x8xf32>
    %88 = tpu.matmul %87, %72, %cst_37 {dimension_numbers = #tpu.dot_dimension_numbers<[1], [0], [0], [1], [0, 0, 1, 1], [], []>} : vector<8x8xf32>, vector<8x8xf32>, vector<8x8xf32> -> vector<8x8xf32>
    %c16 = arith.constant 16 : index
    %c0_38 = arith.constant 0 : index
    %89 = vector.load %arg7[%c16, %c0_38] : memref<32x32xf32, #tpu.memory_space<vmem>>, vector<8x32xf32>
    %cst_39 = arith.constant dense<0.000000e+00> : vector<8x32xf32>
    %90 = tpu.matmul %88, %89, %cst_39 {dimension_numbers = #tpu.dot_dimension_numbers<[1], [0], [0], [1], [0, 0, 1, 1], [], []>} : vector<8x8xf32>, vector<8x32xf32>, vector<8x32xf32> -> vector<8x32xf32>
    %91 = arith.addf %69, %90 : vector<8x32xf32>
    %92 = vector.extract_strided_slice %7 {offsets = [0, 24], sizes = [8, 8], strides = [1, 1]} : vector<8x32xf32> to vector<8x8xf32>
    %93 = vector.extract_strided_slice %8 {offsets = [0, 24], sizes = [8, 8], strides = [1, 1]} : vector<8x32xf32> to vector<8x8xf32>
    %94 = vector.extract_strided_slice %9 {offsets = [0, 24], sizes = [8, 8], strides = [1, 1]} : vector<8x32xf32> to vector<8x8xf32>
    %cst_40 = arith.constant dense<0.000000e+00> : vector<8x8xf32>
    %95 = tpu.matmul %92, %93, %cst_40 {dimension_numbers = #tpu.dot_dimension_numbers<[1], [1], [0], [0], [0, 0, 1, 0], [], []>} : vector<8x8xf32>, vector<8x8xf32>, vector<8x8xf32> -> vector<8x8xf32>
    %cst_41 = arith.constant 0.353553385 : f32
    %96 = vector.broadcast %cst_41 : f32 to vector<8x8xf32>
    %97 = arith.mulf %95, %96 : vector<8x8xf32>
    %cst_42 = arith.constant -1.000000e+10 : f32
    %98 = vector.broadcast %cst_42 : f32 to vector<8x8xf32>
    %99 = arith.select %24, %97, %98 : vector<8x8xi1>, vector<8x8xf32>
    %cst_43 = arith.constant dense<0xFF800000> : vector<8xf32>
    %100 = vector.multi_reduction <maximumf>, %99, %cst_43 [1] : vector<8x8xf32> to vector<8xf32>
    %101 = vector.shape_cast %100 : vector<8xf32> to vector<8x1xf32>
    %102 = vector.broadcast %101 : vector<8x1xf32> to vector<8x8xf32>
    %103 = arith.subf %99, %102 : vector<8x8xf32>
    %104 = math.exp %103 : vector<8x8xf32>
    %cst_44 = arith.constant dense<0.000000e+00> : vector<8xf32>
    %105 = vector.multi_reduction <add>, %104, %cst_44 [1] : vector<8x8xf32> to vector<8xf32>
    %106 = vector.shape_cast %105 : vector<8xf32> to vector<8x1xf32>
    %107 = tpu.reciprocal %106 {approx = true} : vector<8x1xf32> -> vector<8x1xf32>
    %108 = vector.broadcast %107 : vector<8x1xf32> to vector<8x8xf32>
    %109 = arith.mulf %104, %108 : vector<8x8xf32>
    %cst_45 = arith.constant dense<0.000000e+00> : vector<8x8xf32>
    %110 = tpu.matmul %109, %94, %cst_45 {dimension_numbers = #tpu.dot_dimension_numbers<[1], [0], [0], [1], [0, 0, 1, 1], [], []>} : vector<8x8xf32>, vector<8x8xf32>, vector<8x8xf32> -> vector<8x8xf32>
    %c24 = arith.constant 24 : index
    %c0_46 = arith.constant 0 : index
    %111 = vector.load %arg7[%c24, %c0_46] : memref<32x32xf32, #tpu.memory_space<vmem>>, vector<8x32xf32>
    %cst_47 = arith.constant dense<0.000000e+00> : vector<8x32xf32>
    %112 = tpu.matmul %110, %111, %cst_47 {dimension_numbers = #tpu.dot_dimension_numbers<[1], [0], [0], [1], [0, 0, 1, 1], [], []>} : vector<8x8xf32>, vector<8x32xf32>, vector<8x32xf32> -> vector<8x32xf32>
    %113 = arith.addf %91, %112 : vector<8x32xf32>
    %c0_48 = arith.constant 0 : index
    %c0_49 = arith.constant 0 : index
    %114 = vector.load %arg8[%c0_48, %c0_49] : memref<1x32xf32, #tpu.memory_space<vmem>>, vector<1x32xf32>
    %115 = vector.broadcast %114 : vector<1x32xf32> to vector<8x32xf32>
    %116 = arith.addf %113, %115 : vector<8x32xf32>
    %117 = arith.addf %1, %116 : vector<8x32xf32>
    %cst_50 = arith.constant dense<0.000000e+00> : vector<8xf32>
    %118 = vector.multi_reduction <add>, %117, %cst_50 [1] : vector<8x32xf32> to vector<8xf32>
    %119 = vector.shape_cast %118 : vector<8xf32> to vector<8x1xf32>
    %cst_51 = arith.constant 3.200000e+01 : f32
    %120 = vector.broadcast %cst_51 : f32 to vector<8x1xf32>
    %121 = arith.divf %119, %120 : vector<8x1xf32>
    %122 = vector.broadcast %121 : vector<8x1xf32> to vector<8x32xf32>
    %123 = arith.subf %117, %122 : vector<8x32xf32>
    %124 = arith.mulf %123, %123 : vector<8x32xf32>
    %cst_52 = arith.constant dense<0.000000e+00> : vector<8xf32>
    %125 = vector.multi_reduction <add>, %124, %cst_52 [1] : vector<8x32xf32> to vector<8xf32>
    %126 = vector.shape_cast %125 : vector<8xf32> to vector<8x1xf32>
    %cst_53 = arith.constant 3.200000e+01 : f32
    %127 = vector.broadcast %cst_53 : f32 to vector<8x1xf32>
    %128 = arith.divf %126, %127 : vector<8x1xf32>
    %129 = vector.broadcast %121 : vector<8x1xf32> to vector<8x32xf32>
    %130 = arith.subf %117, %129 : vector<8x32xf32>
    %cst_54 = arith.constant 9.99999974E-6 : f32
    %131 = vector.broadcast %cst_54 : f32 to vector<8x1xf32>
    %132 = arith.addf %128, %131 : vector<8x1xf32>
    %133 = math.rsqrt %132 : vector<8x1xf32>
    %134 = vector.broadcast %133 : vector<8x1xf32> to vector<8x32xf32>
    %135 = arith.mulf %130, %134 : vector<8x32xf32>
    %c0_55 = arith.constant 0 : index
    %c0_56 = arith.constant 0 : index
    %136 = vector.load %arg9[%c0_55, %c0_56] : memref<1x32xf32, #tpu.memory_space<vmem>>, vector<1x32xf32>
    %137 = vector.broadcast %136 : vector<1x32xf32> to vector<8x32xf32>
    %138 = arith.mulf %135, %137 : vector<8x32xf32>
    %c0_57 = arith.constant 0 : index
    %c0_58 = arith.constant 0 : index
    %139 = vector.load %arg10[%c0_57, %c0_58] : memref<1x32xf32, #tpu.memory_space<vmem>>, vector<1x32xf32>
    %140 = vector.broadcast %139 : vector<1x32xf32> to vector<8x32xf32>
    %141 = arith.addf %138, %140 : vector<8x32xf32>
    %c0_59 = arith.constant 0 : index
    %c0_60 = arith.constant 0 : index
    %c0_61 = arith.constant 0 : index
    %142 = vector.load %arg11[%c0_59, %c0_60, %c0_61] : memref<1x8x32xf32, #tpu.memory_space<vmem>>, vector<1x8x32xf32>
    %143 = vector.shape_cast %142 : vector<1x8x32xf32> to vector<8x32xf32>
    %144 = vector.shape_cast %141 : vector<8x32xf32> to vector<1x8x32xf32>
    tpu.vector_store %arg11[%c0_59, %c0_60, %c0_61], %144 {strides = array<i32>} : memref<1x8x32xf32, #tpu.memory_space<vmem>>, vector<1x8x32xf32>,
    return
  }
  func.func @transform_0(%arg0: i32) -> (i32, i32, i32) {
    %c0_i32 = arith.constant 0 : i32
    %c0_i32_0 = arith.constant 0 : i32
    %c0_i32_1 = arith.constant 0 : i32
    return %arg0, %c0_i32, %c0_i32_0 : i32, i32, i32
  }
  func.func @transform_1(%arg0: i32) -> (i32, i32, i32) {
    %c0_i32 = arith.constant 0 : i32
    %c0_i32_0 = arith.constant 0 : i32
    %c0_i32_1 = arith.constant 0 : i32
    return %arg0, %c0_i32, %c0_i32_0 : i32, i32, i32
  }
  func.func @transform_2(%arg0: i32) -> (i32, i32, i32) {
    %c0_i32 = arith.constant 0 : i32
    %c0_i32_0 = arith.constant 0 : i32
    %c0_i32_1 = arith.constant 0 : i32
    return %arg0, %c0_i32, %c0_i32_0 : i32, i32, i32
  }
  func.func @transform_3(%arg0: i32) -> (i32, i32, i32) {
    %c0_i32 = arith.constant 0 : i32
    %c0_i32_0 = arith.constant 0 : i32
    %c0_i32_1 = arith.constant 0 : i32
    return %arg0, %c0_i32, %c0_i32_0 : i32, i32, i32
  }
  func.func @transform_4(%arg0: i32) -> (i32, i32) {
    %c0_i32 = arith.constant 0 : i32
    %c0_i32_0 = arith.constant 0 : i32
    %c0_i32_1 = arith.constant 0 : i32
    return %c0_i32, %c0_i32_0 : i32, i32
  }
  func.func @transform_5(%arg0: i32) -> (i32, i32) {
    %c0_i32 = arith.constant 0 : i32
    %c0_i32_0 = arith.constant 0 : i32
    %c0_i32_1 = arith.constant 0 : i32
    return %c0_i32, %c0_i32_0 : i32, i32
  }
  func.func @transform_6(%arg0: i32) -> (i32, i32) {
    %c0_i32 = arith.constant 0 : i32
    %c0_i32_0 = arith.constant 0 : i32
    %c0_i32_1 = arith.constant 0 : i32
    return %c0_i32, %c0_i32_0 : i32, i32
  }
  func.func @transform_7(%arg0: i32) -> (i32, i32) {
    %c0_i32 = arith.constant 0 : i32
    %c0_i32_0 = arith.constant 0 : i32
    %c0_i32_1 = arith.constant 0 : i32
    return %c0_i32, %c0_i32_0 : i32, i32
  }
  func.func @transform_8(%arg0: i32) -> (i32, i32) {
    %c0_i32 = arith.constant 0 : i32
    %c0_i32_0 = arith.constant 0 : i32
    %c0_i32_1 = arith.constant 0 : i32
    return %c0_i32, %c0_i32_0 : i32, i32
  }
  func.func @transform_9(%arg0: i32) -> (i32, i32) {
    %c0_i32 = arith.constant 0 : i32
    %c0_i32_0 = arith.constant 0 : i32
    %c0_i32_1 = arith.constant 0 : i32
    return %c0_i32, %c0_i32_0 : i32, i32
  }
  func.func @transform_10(%arg0: i32) -> (i32, i32, i32) {
    %c0_i32 = arith.constant 0 : i32
    %c0_i32_0 = arith.constant 0 : i32
    %c0_i32_1 = arith.constant 0 : i32
    return %arg0, %c0_i32, %c0_i32_0 : i32, i32, i32
  }
}

module attributes {stable_mosaic.version = 11 : i64} {
  func.func @_ffn_ln_kernel(%arg0: i32, %arg1: memref<16x32xf32, #tpu.memory_space<vmem>>, %arg2: memref<32x64xf32, #tpu.memory_space<vmem>>, %arg3: memref<1x64xf32, #tpu.memory_space<vmem>>, %arg4: memref<64x32xf32, #tpu.memory_space<vmem>>, %arg5: memref<1x32xf32, #tpu.memory_space<vmem>>, %arg6: memref<1x32xf32, #tpu.memory_space<vmem>>, %arg7: memref<1x32xf32, #tpu.memory_space<vmem>>, %arg8: memref<16x32xf32, #tpu.memory_space<vmem>>) attributes {dimension_semantics = [#tpu.dimension_semantics<parallel>], iteration_bounds = array<i64: 1>, scalar_prefetch = 0 : i64, scratch_operands = 0 : i64, tpu.core_type = #tpu.core_type<tc>, window_params = [{transform_indices = @transform_0, window_bounds = array<i64: 16, 32>}, {pipeline_mode = #tpu.pipeline_mode<synchronous>, transform_indices = @transform_1, window_bounds = array<i64: 32, 64>}, {pipeline_mode = #tpu.pipeline_mode<synchronous>, transform_indices = @transform_2, window_bounds = array<i64: 1, 64>}, {pipeline_mode = #tpu.pipeline_mode<synchronous>, transform_indices = @transform_3, window_bounds = array<i64: 64, 32>}, {pipeline_mode = #tpu.pipeline_mode<synchronous>, transform_indices = @transform_4, window_bounds = array<i64: 1, 32>}, {pipeline_mode = #tpu.pipeline_mode<synchronous>, transform_indices = @transform_5, window_bounds = array<i64: 1, 32>}, {pipeline_mode = #tpu.pipeline_mode<synchronous>, transform_indices = @transform_6, window_bounds = array<i64: 1, 32>}, {transform_indices = @transform_7, window_bounds = array<i64: 16, 32>}]} {
    %c0 = arith.constant 0 : index
    %c0_0 = arith.constant 0 : index
    %0 = vector.load %arg1[%c0, %c0_0] : memref<16x32xf32, #tpu.memory_space<vmem>>, vector<16x32xf32>
    %c0_1 = arith.constant 0 : index
    %c0_2 = arith.constant 0 : index
    %1 = vector.load %arg2[%c0_1, %c0_2] : memref<32x64xf32, #tpu.memory_space<vmem>>, vector<32x64xf32>
    %cst = arith.constant dense<0.000000e+00> : vector<16x64xf32>
    %2 = tpu.matmul %0, %1, %cst {dimension_numbers = #tpu.dot_dimension_numbers<[1], [0], [0], [1], [0, 0, 1, 1], [], []>} : vector<16x32xf32>, vector<32x64xf32>, vector<16x64xf32> -> vector<16x64xf32>
    %c0_3 = arith.constant 0 : index
    %c0_4 = arith.constant 0 : index
    %3 = vector.load %arg3[%c0_3, %c0_4] : memref<1x64xf32, #tpu.memory_space<vmem>>, vector<1x64xf32>
    %4 = vector.broadcast %3 : vector<1x64xf32> to vector<16x64xf32>
    %5 = arith.addf %2, %4 : vector<16x64xf32>
    %cst_5 = arith.constant 0.000000e+00 : f32
    %6 = vector.broadcast %cst_5 : f32 to vector<16x64xf32>
    %7 = arith.maximumf %5, %6 : vector<16x64xf32>
    %c0_6 = arith.constant 0 : index
    %c0_7 = arith.constant 0 : index
    %8 = vector.load %arg4[%c0_6, %c0_7] : memref<64x32xf32, #tpu.memory_space<vmem>>, vector<64x32xf32>
    %cst_8 = arith.constant dense<0.000000e+00> : vector<16x32xf32>
    %9 = tpu.matmul %7, %8, %cst_8 {dimension_numbers = #tpu.dot_dimension_numbers<[1], [0], [0], [1], [0, 0, 1, 1], [], []>} : vector<16x64xf32>, vector<64x32xf32>, vector<16x32xf32> -> vector<16x32xf32>
    %c0_9 = arith.constant 0 : index
    %c0_10 = arith.constant 0 : index
    %10 = vector.load %arg5[%c0_9, %c0_10] : memref<1x32xf32, #tpu.memory_space<vmem>>, vector<1x32xf32>
    %11 = vector.broadcast %10 : vector<1x32xf32> to vector<16x32xf32>
    %12 = arith.addf %9, %11 : vector<16x32xf32>
    %13 = arith.addf %0, %12 : vector<16x32xf32>
    %cst_11 = arith.constant dense<0.000000e+00> : vector<16xf32>
    %14 = vector.multi_reduction <add>, %13, %cst_11 [1] : vector<16x32xf32> to vector<16xf32>
    %15 = vector.shape_cast %14 : vector<16xf32> to vector<16x1xf32>
    %cst_12 = arith.constant 3.200000e+01 : f32
    %16 = vector.broadcast %cst_12 : f32 to vector<16x1xf32>
    %17 = arith.divf %15, %16 : vector<16x1xf32>
    %18 = vector.broadcast %17 : vector<16x1xf32> to vector<16x32xf32>
    %19 = arith.subf %13, %18 : vector<16x32xf32>
    %20 = arith.mulf %19, %19 : vector<16x32xf32>
    %cst_13 = arith.constant dense<0.000000e+00> : vector<16xf32>
    %21 = vector.multi_reduction <add>, %20, %cst_13 [1] : vector<16x32xf32> to vector<16xf32>
    %22 = vector.shape_cast %21 : vector<16xf32> to vector<16x1xf32>
    %cst_14 = arith.constant 3.200000e+01 : f32
    %23 = vector.broadcast %cst_14 : f32 to vector<16x1xf32>
    %24 = arith.divf %22, %23 : vector<16x1xf32>
    %25 = vector.broadcast %17 : vector<16x1xf32> to vector<16x32xf32>
    %26 = arith.subf %13, %25 : vector<16x32xf32>
    %cst_15 = arith.constant 9.99999974E-6 : f32
    %27 = vector.broadcast %cst_15 : f32 to vector<16x1xf32>
    %28 = arith.addf %24, %27 : vector<16x1xf32>
    %29 = math.rsqrt %28 : vector<16x1xf32>
    %30 = vector.broadcast %29 : vector<16x1xf32> to vector<16x32xf32>
    %31 = arith.mulf %26, %30 : vector<16x32xf32>
    %c0_16 = arith.constant 0 : index
    %c0_17 = arith.constant 0 : index
    %32 = vector.load %arg6[%c0_16, %c0_17] : memref<1x32xf32, #tpu.memory_space<vmem>>, vector<1x32xf32>
    %33 = vector.broadcast %32 : vector<1x32xf32> to vector<16x32xf32>
    %34 = arith.mulf %31, %33 : vector<16x32xf32>
    %c0_18 = arith.constant 0 : index
    %c0_19 = arith.constant 0 : index
    %35 = vector.load %arg7[%c0_18, %c0_19] : memref<1x32xf32, #tpu.memory_space<vmem>>, vector<1x32xf32>
    %36 = vector.broadcast %35 : vector<1x32xf32> to vector<16x32xf32>
    %37 = arith.addf %34, %36 : vector<16x32xf32>
    %c0_20 = arith.constant 0 : index
    %c0_21 = arith.constant 0 : index
    %38 = vector.load %arg8[%c0_20, %c0_21] : memref<16x32xf32, #tpu.memory_space<vmem>>, vector<16x32xf32>
    tpu.vector_store %arg8[%c0_20, %c0_21], %37 {strides = array<i32>} : memref<16x32xf32, #tpu.memory_space<vmem>>, vector<16x32xf32>,
    return
  }
  func.func @transform_0(%arg0: i32) -> (i32, i32) {
    %c0_i32 = arith.constant 0 : i32
    %c0_i32_0 = arith.constant 0 : i32
    return %arg0, %c0_i32 : i32, i32
  }
  func.func @transform_1(%arg0: i32) -> (i32, i32) {
    %c0_i32 = arith.constant 0 : i32
    %c0_i32_0 = arith.constant 0 : i32
    %c0_i32_1 = arith.constant 0 : i32
    return %c0_i32, %c0_i32_0 : i32, i32
  }
  func.func @transform_2(%arg0: i32) -> (i32, i32) {
    %c0_i32 = arith.constant 0 : i32
    %c0_i32_0 = arith.constant 0 : i32
    %c0_i32_1 = arith.constant 0 : i32
    return %c0_i32, %c0_i32_0 : i32, i32
  }
  func.func @transform_3(%arg0: i32) -> (i32, i32) {
    %c0_i32 = arith.constant 0 : i32
    %c0_i32_0 = arith.constant 0 : i32
    %c0_i32_1 = arith.constant 0 : i32
    return %c0_i32, %c0_i32_0 : i32, i32
  }
  func.func @transform_4(%arg0: i32) -> (i32, i32) {
    %c0_i32 = arith.constant 0 : i32
    %c0_i32_0 = arith.constant 0 : i32
    %c0_i32_1 = arith.constant 0 : i32
    return %c0_i32, %c0_i32_0 : i32, i32
  }
  func.func @transform_5(%arg0: i32) -> (i32, i32) {
    %c0_i32 = arith.constant 0 : i32
    %c0_i32_0 = arith.constant 0 : i32
    %c0_i32_1 = arith.constant 0 : i32
    return %c0_i32, %c0_i32_0 : i32, i32
  }
  func.func @transform_6(%arg0: i32) -> (i32, i32) {
    %c0_i32 = arith.constant 0 : i32
    %c0_i32_0 = arith.constant 0 : i32
    %c0_i32_1 = arith.constant 0 : i32
    return %c0_i32, %c0_i32_0 : i32, i32
  }
  func.func @transform_7(%arg0: i32) -> (i32, i32) {
    %c0_i32 = arith.constant 0 : i32
    %c0_i32_0 = arith.constant 0 : i32
    return %arg0, %c0_i32 : i32, i32
  }
}

module attributes {stable_mosaic.version = 11 : i64} {
  func.func @_linear_kernel(%arg0: i32, %arg1: i32, %arg2: memref<16x32xf32, #tpu.memory_space<vmem>>, %arg3: memref<32x50xf32, #tpu.memory_space<vmem>>, %arg4: memref<1x50xf32, #tpu.memory_space<vmem>>, %arg5: memref<16x50xf32, #tpu.memory_space<vmem>>) attributes {dimension_semantics = [#tpu.dimension_semantics<parallel>, #tpu.dimension_semantics<parallel>], iteration_bounds = array<i64: 1, 1>, scalar_prefetch = 0 : i64, scratch_operands = 0 : i64, tpu.core_type = #tpu.core_type<tc>, window_params = [{transform_indices = @transform_0, window_bounds = array<i64: 16, 32>}, {transform_indices = @transform_1, window_bounds = array<i64: 32, 50>}, {transform_indices = @transform_2, window_bounds = array<i64: 1, 50>}, {transform_indices = @transform_3, window_bounds = array<i64: 16, 50>}]} {
    %c0 = arith.constant 0 : index
    %c0_0 = arith.constant 0 : index
    %0 = vector.load %arg2[%c0, %c0_0] : memref<16x32xf32, #tpu.memory_space<vmem>>, vector<16x32xf32>
    %c0_1 = arith.constant 0 : index
    %c0_2 = arith.constant 0 : index
    %1 = vector.load %arg3[%c0_1, %c0_2] : memref<32x50xf32, #tpu.memory_space<vmem>>, vector<32x50xf32>
    %cst = arith.constant dense<0.000000e+00> : vector<16x50xf32>
    %2 = tpu.matmul %0, %1, %cst {dimension_numbers = #tpu.dot_dimension_numbers<[1], [0], [0], [1], [0, 0, 1, 1], [], []>} : vector<16x32xf32>, vector<32x50xf32>, vector<16x50xf32> -> vector<16x50xf32>
    %c0_3 = arith.constant 0 : index
    %c0_4 = arith.constant 0 : index
    %3 = vector.load %arg4[%c0_3, %c0_4] : memref<1x50xf32, #tpu.memory_space<vmem>>, vector<1x50xf32>
    %4 = vector.broadcast %3 : vector<1x50xf32> to vector<16x50xf32>
    %5 = arith.addf %2, %4 : vector<16x50xf32>
    %c0_5 = arith.constant 0 : index
    %c0_6 = arith.constant 0 : index
    %6 = vector.load %arg5[%c0_5, %c0_6] : memref<16x50xf32, #tpu.memory_space<vmem>>, vector<16x50xf32>
    tpu.vector_store %arg5[%c0_5, %c0_6], %5 {strides = array<i32>} : memref<16x50xf32, #tpu.memory_space<vmem>>, vector<16x50xf32>,
    return
  }
  func.func @transform_0(%arg0: i32, %arg1: i32) -> (i32, i32) {
    %c0_i32 = arith.constant 0 : i32
    %c0_i32_0 = arith.constant 0 : i32
    return %arg0, %c0_i32 : i32, i32
  }
  func.func @transform_1(%arg0: i32, %arg1: i32) -> (i32, i32) {
    %c0_i32 = arith.constant 0 : i32
    %c0_i32_0 = arith.constant 0 : i32
    return %c0_i32, %arg1 : i32, i32
  }
  func.func @transform_2(%arg0: i32, %arg1: i32) -> (i32, i32) {
    %c0_i32 = arith.constant 0 : i32
    %c0_i32_0 = arith.constant 0 : i32
    return %c0_i32, %arg1 : i32, i32
  }
  func.func @transform_3(%arg0: i32, %arg1: i32) -> (i32, i32) {
    %c0_i32 = arith.constant 0 : i32
    return %arg0, %arg1 : i32, i32
  }
}

module attributes {stable_mosaic.version = 11 : i64} {
  func.func @_mha_ln_kernel(%arg0: i32, %arg1: memref<1x8x32xf32, #tpu.memory_space<vmem>>, %arg2: memref<1x8x32xf32, #tpu.memory_space<vmem>>, %arg3: memref<1x8x1xf32, #tpu.memory_space<vmem>>, %arg4: memref<1x1x8xf32, #tpu.memory_space<vmem>>, %arg5: memref<32x96xf32, #tpu.memory_space<vmem>>, %arg6: memref<1x96xf32, #tpu.memory_space<vmem>>, %arg7: memref<32x32xf32, #tpu.memory_space<vmem>>, %arg8: memref<1x32xf32, #tpu.memory_space<vmem>>, %arg9: memref<1x32xf32, #tpu.memory_space<vmem>>, %arg10: memref<1x32xf32, #tpu.memory_space<vmem>>, %arg11: memref<1x8x32xf32, #tpu.memory_space<vmem>>) attributes {dimension_semantics = [#tpu.dimension_semantics<parallel>], iteration_bounds = array<i64: 2>, scalar_prefetch = 0 : i64, scratch_operands = 0 : i64, tpu.core_type = #tpu.core_type<tc>, window_params = [{transform_indices = @transform_0, window_bounds = array<i64: 1, 8, 32>}, {transform_indices = @transform_1, window_bounds = array<i64: 1, 8, 32>}, {transform_indices = @transform_2, window_bounds = array<i64: 1, 8, 1>}, {transform_indices = @transform_3, window_bounds = array<i64: 1, 1, 8>}, {pipeline_mode = #tpu.pipeline_mode<synchronous>, transform_indices = @transform_4, window_bounds = array<i64: 32, 96>}, {pipeline_mode = #tpu.pipeline_mode<synchronous>, transform_indices = @transform_5, window_bounds = array<i64: 1, 96>}, {pipeline_mode = #tpu.pipeline_mode<synchronous>, transform_indices = @transform_6, window_bounds = array<i64: 32, 32>}, {pipeline_mode = #tpu.pipeline_mode<synchronous>, transform_indices = @transform_7, window_bounds = array<i64: 1, 32>}, {pipeline_mode = #tpu.pipeline_mode<synchronous>, transform_indices = @transform_8, window_bounds = array<i64: 1, 32>}, {pipeline_mode = #tpu.pipeline_mode<synchronous>, transform_indices = @transform_9, window_bounds = array<i64: 1, 32>}, {transform_indices = @transform_10, window_bounds = array<i64: 1, 8, 32>}]} {
    %c0 = arith.constant 0 : index
    %c0_0 = arith.constant 0 : index
    %c0_1 = arith.constant 0 : index
    %0 = vector.load %arg1[%c0, %c0_0, %c0_1] : memref<1x8x32xf32, #tpu.memory_space<vmem>>, vector<1x8x32xf32>
    %1 = vector.shape_cast %0 : vector<1x8x32xf32> to vector<8x32xf32>
    %c0_2 = arith.constant 0 : index
    %c0_3 = arith.constant 0 : index
    %c0_4 = arith.constant 0 : index
    %2 = vector.load %arg2[%c0_2, %c0_3, %c0_4] : memref<1x8x32xf32, #tpu.memory_space<vmem>>, vector<1x8x32xf32>
    %3 = vector.shape_cast %2 : vector<1x8x32xf32> to vector<8x32xf32>
    %c0_5 = arith.constant 0 : index
    %c0_6 = arith.constant 0 : index
    %4 = vector.load %arg5[%c0_5, %c0_6] : memref<32x96xf32, #tpu.memory_space<vmem>>, vector<32x32xf32>
    %cst = arith.constant dense<0.000000e+00> : vector<8x32xf32>
    %5 = tpu.matmul %1, %4, %cst {dimension_numbers = #tpu.dot_dimension_numbers<[1], [0], [0], [1], [0, 0, 1, 1], [], []>} : vector<8x32xf32>, vector<32x32xf32>, vector<8x32xf32> -> vector<8x32xf32>
    %c0_7 = arith.constant 0 : index
    %c0_8 = arith.constant 0 : index
    %6 = vector.load %arg6[%c0_7, %c0_8] : memref<1x96xf32, #tpu.memory_space<vmem>>, vector<1x32xf32>
    %7 = vector.broadcast %6 : vector<1x32xf32> to vector<8x32xf32>
    %8 = arith.addf %5, %7 : vector<8x32xf32>
    %c0_9 = arith.constant 0 : index
    %c32 = arith.constant 32 : index
    %9 = vector.load %arg5[%c0_9, %c32] : memref<32x96xf32, #tpu.memory_space<vmem>>, vector<32x64xf32>
    %cst_10 = arith.constant dense<0.000000e+00> : vector<8x64xf32>
    %10 = tpu.matmul %3, %9, %cst_10 {dimension_numbers = #tpu.dot_dimension_numbers<[1], [0], [0], [1], [0, 0, 1, 1], [], []>} : vector<8x32xf32>, vector<32x64xf32>, vector<8x64xf32> -> vector<8x64xf32>
    %c0_11 = arith.constant 0 : index
    %c32_12 = arith.constant 32 : index
    %11 = vector.load %arg6[%c0_11, %c32_12] : memref<1x96xf32, #tpu.memory_space<vmem>>, vector<1x64xf32>
    %12 = vector.broadcast %11 : vector<1x64xf32> to vector<8x64xf32>
    %13 = arith.addf %10, %12 : vector<8x64xf32>
    %14 = vector.extract_strided_slice %13 {offsets = [0, 0], sizes = [8, 32], strides = [1, 1]} : vector<8x64xf32> to vector<8x32xf32>
    %15 = vector.extract_strided_slice %13 {offsets = [0, 32], sizes = [8, 32], strides = [1, 1]} : vector<8x64xf32> to vector<8x32xf32>
    %c0_13 = arith.constant 0 : index
    %c0_14 = arith.constant 0 : index
    %c0_15 = arith.constant 0 : index
    %16 = vector.load %arg3[%c0_13, %c0_14, %c0_15] : memref<1x8x1xf32, #tpu.memory_space<vmem>>, vector<1x8x1xf32>
    %17 = vector.shape_cast %16 : vector<1x8x1xf32> to vector<8x1xf32>
    %c0_16 = arith.constant 0 : index
    %c0_17 = arith.constant 0 : index
    %c0_18 = arith.constant 0 : index
    %18 = vector.load %arg4[%c0_16, %c0_17, %c0_18] : memref<1x1x8xf32, #tpu.memory_space<vmem>>, vector<1x1x8xf32>
    %19 = vector.shape_cast %18 : vector<1x1x8xf32> to vector<1x8xf32>
    %cst_19 = arith.constant 5.000000e-01 : f32
    %20 = vector.broadcast %cst_19 : f32 to vector<8x1xf32>
    %21 = arith.cmpf ogt, %17, %20 : vector<8x1xf32>
    %cst_20 = arith.constant 5.000000e-01 : f32
    %22 = vector.broadcast %cst_20 : f32 to vector<1x8xf32>
    %23 = arith.cmpf ogt, %19, %22 : vector<1x8xf32>
    %24 = vector.broadcast %21 : vector<8x1xi1> to vector<8x8xi1>
    %25 = vector.broadcast %23 : vector<1x8xi1> to vector<8x8xi1>
    %26 = arith.andi %24, %25 : vector<8x8xi1>
    %cst_21 = arith.constant 0.000000e+00 : f32
    %27 = vector.broadcast %cst_21 : f32 to vector<8x32xf32>
    %28 = vector.extract_strided_slice %8 {offsets = [0, 0], sizes = [8, 8], strides = [1, 1]} : vector<8x32xf32> to vector<8x8xf32>
    %29 = vector.extract_strided_slice %14 {offsets = [0, 0], sizes = [8, 8], strides = [1, 1]} : vector<8x32xf32> to vector<8x8xf32>
    %30 = vector.extract_strided_slice %15 {offsets = [0, 0], sizes = [8, 8], strides = [1, 1]} : vector<8x32xf32> to vector<8x8xf32>
    %cst_22 = arith.constant dense<0.000000e+00> : vector<8x8xf32>
    %31 = tpu.matmul %28, %29, %cst_22 {dimension_numbers = #tpu.dot_dimension_numbers<[1], [1], [0], [0], [0, 0, 1, 0], [], []>} : vector<8x8xf32>, vector<8x8xf32>, vector<8x8xf32> -> vector<8x8xf32>
    %cst_23 = arith.constant 0.353553385 : f32
    %32 = vector.broadcast %cst_23 : f32 to vector<8x8xf32>
    %33 = arith.mulf %31, %32 : vector<8x8xf32>
    %cst_24 = arith.constant -1.000000e+10 : f32
    %34 = vector.broadcast %cst_24 : f32 to vector<8x8xf32>
    %35 = arith.select %26, %33, %34 : vector<8x8xi1>, vector<8x8xf32>
    %cst_25 = arith.constant dense<0xFF800000> : vector<8xf32>
    %36 = vector.multi_reduction <maximumf>, %35, %cst_25 [1] : vector<8x8xf32> to vector<8xf32>
    %37 = vector.shape_cast %36 : vector<8xf32> to vector<8x1xf32>
    %38 = vector.broadcast %37 : vector<8x1xf32> to vector<8x8xf32>
    %39 = arith.subf %35, %38 : vector<8x8xf32>
    %40 = math.exp %39 : vector<8x8xf32>
    %cst_26 = arith.constant dense<0.000000e+00> : vector<8xf32>
    %41 = vector.multi_reduction <add>, %40, %cst_26 [1] : vector<8x8xf32> to vector<8xf32>
    %42 = vector.shape_cast %41 : vector<8xf32> to vector<8x1xf32>
    %43 = tpu.reciprocal %42 {approx = true} : vector<8x1xf32> -> vector<8x1xf32>
    %44 = vector.broadcast %43 : vector<8x1xf32> to vector<8x8xf32>
    %45 = arith.mulf %40, %44 : vector<8x8xf32>
    %cst_27 = arith.constant dense<0.000000e+00> : vector<8x8xf32>
    %46 = tpu.matmul %45, %30, %cst_27 {dimension_numbers = #tpu.dot_dimension_numbers<[1], [0], [0], [1], [0, 0, 1, 1], [], []>} : vector<8x8xf32>, vector<8x8xf32>, vector<8x8xf32> -> vector<8x8xf32>
    %c0_28 = arith.constant 0 : index
    %c0_29 = arith.constant 0 : index
    %47 = vector.load %arg7[%c0_28, %c0_29] : memref<32x32xf32, #tpu.memory_space<vmem>>, vector<8x32xf32>
    %cst_30 = arith.constant dense<0.000000e+00> : vector<8x32xf32>
    %48 = tpu.matmul %46, %47, %cst_30 {dimension_numbers = #tpu.dot_dimension_numbers<[1], [0], [0], [1], [0, 0, 1, 1], [], []>} : vector<8x8xf32>, vector<8x32xf32>, vector<8x32xf32> -> vector<8x32xf32>
    %49 = arith.addf %27, %48 : vector<8x32xf32>
    %50 = vector.extract_strided_slice %8 {offsets = [0, 8], sizes = [8, 8], strides = [1, 1]} : vector<8x32xf32> to vector<8x8xf32>
    %51 = vector.extract_strided_slice %14 {offsets = [0, 8], sizes = [8, 8], strides = [1, 1]} : vector<8x32xf32> to vector<8x8xf32>
    %52 = vector.extract_strided_slice %15 {offsets = [0, 8], sizes = [8, 8], strides = [1, 1]} : vector<8x32xf32> to vector<8x8xf32>
    %cst_31 = arith.constant dense<0.000000e+00> : vector<8x8xf32>
    %53 = tpu.matmul %50, %51, %cst_31 {dimension_numbers = #tpu.dot_dimension_numbers<[1], [1], [0], [0], [0, 0, 1, 0], [], []>} : vector<8x8xf32>, vector<8x8xf32>, vector<8x8xf32> -> vector<8x8xf32>
    %cst_32 = arith.constant 0.353553385 : f32
    %54 = vector.broadcast %cst_32 : f32 to vector<8x8xf32>
    %55 = arith.mulf %53, %54 : vector<8x8xf32>
    %cst_33 = arith.constant -1.000000e+10 : f32
    %56 = vector.broadcast %cst_33 : f32 to vector<8x8xf32>
    %57 = arith.select %26, %55, %56 : vector<8x8xi1>, vector<8x8xf32>
    %cst_34 = arith.constant dense<0xFF800000> : vector<8xf32>
    %58 = vector.multi_reduction <maximumf>, %57, %cst_34 [1] : vector<8x8xf32> to vector<8xf32>
    %59 = vector.shape_cast %58 : vector<8xf32> to vector<8x1xf32>
    %60 = vector.broadcast %59 : vector<8x1xf32> to vector<8x8xf32>
    %61 = arith.subf %57, %60 : vector<8x8xf32>
    %62 = math.exp %61 : vector<8x8xf32>
    %cst_35 = arith.constant dense<0.000000e+00> : vector<8xf32>
    %63 = vector.multi_reduction <add>, %62, %cst_35 [1] : vector<8x8xf32> to vector<8xf32>
    %64 = vector.shape_cast %63 : vector<8xf32> to vector<8x1xf32>
    %65 = tpu.reciprocal %64 {approx = true} : vector<8x1xf32> -> vector<8x1xf32>
    %66 = vector.broadcast %65 : vector<8x1xf32> to vector<8x8xf32>
    %67 = arith.mulf %62, %66 : vector<8x8xf32>
    %cst_36 = arith.constant dense<0.000000e+00> : vector<8x8xf32>
    %68 = tpu.matmul %67, %52, %cst_36 {dimension_numbers = #tpu.dot_dimension_numbers<[1], [0], [0], [1], [0, 0, 1, 1], [], []>} : vector<8x8xf32>, vector<8x8xf32>, vector<8x8xf32> -> vector<8x8xf32>
    %c8 = arith.constant 8 : index
    %c0_37 = arith.constant 0 : index
    %69 = vector.load %arg7[%c8, %c0_37] : memref<32x32xf32, #tpu.memory_space<vmem>>, vector<8x32xf32>
    %cst_38 = arith.constant dense<0.000000e+00> : vector<8x32xf32>
    %70 = tpu.matmul %68, %69, %cst_38 {dimension_numbers = #tpu.dot_dimension_numbers<[1], [0], [0], [1], [0, 0, 1, 1], [], []>} : vector<8x8xf32>, vector<8x32xf32>, vector<8x32xf32> -> vector<8x32xf32>
    %71 = arith.addf %49, %70 : vector<8x32xf32>
    %72 = vector.extract_strided_slice %8 {offsets = [0, 16], sizes = [8, 8], strides = [1, 1]} : vector<8x32xf32> to vector<8x8xf32>
    %73 = vector.extract_strided_slice %14 {offsets = [0, 16], sizes = [8, 8], strides = [1, 1]} : vector<8x32xf32> to vector<8x8xf32>
    %74 = vector.extract_strided_slice %15 {offsets = [0, 16], sizes = [8, 8], strides = [1, 1]} : vector<8x32xf32> to vector<8x8xf32>
    %cst_39 = arith.constant dense<0.000000e+00> : vector<8x8xf32>
    %75 = tpu.matmul %72, %73, %cst_39 {dimension_numbers = #tpu.dot_dimension_numbers<[1], [1], [0], [0], [0, 0, 1, 0], [], []>} : vector<8x8xf32>, vector<8x8xf32>, vector<8x8xf32> -> vector<8x8xf32>
    %cst_40 = arith.constant 0.353553385 : f32
    %76 = vector.broadcast %cst_40 : f32 to vector<8x8xf32>
    %77 = arith.mulf %75, %76 : vector<8x8xf32>
    %cst_41 = arith.constant -1.000000e+10 : f32
    %78 = vector.broadcast %cst_41 : f32 to vector<8x8xf32>
    %79 = arith.select %26, %77, %78 : vector<8x8xi1>, vector<8x8xf32>
    %cst_42 = arith.constant dense<0xFF800000> : vector<8xf32>
    %80 = vector.multi_reduction <maximumf>, %79, %cst_42 [1] : vector<8x8xf32> to vector<8xf32>
    %81 = vector.shape_cast %80 : vector<8xf32> to vector<8x1xf32>
    %82 = vector.broadcast %81 : vector<8x1xf32> to vector<8x8xf32>
    %83 = arith.subf %79, %82 : vector<8x8xf32>
    %84 = math.exp %83 : vector<8x8xf32>
    %cst_43 = arith.constant dense<0.000000e+00> : vector<8xf32>
    %85 = vector.multi_reduction <add>, %84, %cst_43 [1] : vector<8x8xf32> to vector<8xf32>
    %86 = vector.shape_cast %85 : vector<8xf32> to vector<8x1xf32>
    %87 = tpu.reciprocal %86 {approx = true} : vector<8x1xf32> -> vector<8x1xf32>
    %88 = vector.broadcast %87 : vector<8x1xf32> to vector<8x8xf32>
    %89 = arith.mulf %84, %88 : vector<8x8xf32>
    %cst_44 = arith.constant dense<0.000000e+00> : vector<8x8xf32>
    %90 = tpu.matmul %89, %74, %cst_44 {dimension_numbers = #tpu.dot_dimension_numbers<[1], [0], [0], [1], [0, 0, 1, 1], [], []>} : vector<8x8xf32>, vector<8x8xf32>, vector<8x8xf32> -> vector<8x8xf32>
    %c16 = arith.constant 16 : index
    %c0_45 = arith.constant 0 : index
    %91 = vector.load %arg7[%c16, %c0_45] : memref<32x32xf32, #tpu.memory_space<vmem>>, vector<8x32xf32>
    %cst_46 = arith.constant dense<0.000000e+00> : vector<8x32xf32>
    %92 = tpu.matmul %90, %91, %cst_46 {dimension_numbers = #tpu.dot_dimension_numbers<[1], [0], [0], [1], [0, 0, 1, 1], [], []>} : vector<8x8xf32>, vector<8x32xf32>, vector<8x32xf32> -> vector<8x32xf32>
    %93 = arith.addf %71, %92 : vector<8x32xf32>
    %94 = vector.extract_strided_slice %8 {offsets = [0, 24], sizes = [8, 8], strides = [1, 1]} : vector<8x32xf32> to vector<8x8xf32>
    %95 = vector.extract_strided_slice %14 {offsets = [0, 24], sizes = [8, 8], strides = [1, 1]} : vector<8x32xf32> to vector<8x8xf32>
    %96 = vector.extract_strided_slice %15 {offsets = [0, 24], sizes = [8, 8], strides = [1, 1]} : vector<8x32xf32> to vector<8x8xf32>
    %cst_47 = arith.constant dense<0.000000e+00> : vector<8x8xf32>
    %97 = tpu.matmul %94, %95, %cst_47 {dimension_numbers = #tpu.dot_dimension_numbers<[1], [1], [0], [0], [0, 0, 1, 0], [], []>} : vector<8x8xf32>, vector<8x8xf32>, vector<8x8xf32> -> vector<8x8xf32>
    %cst_48 = arith.constant 0.353553385 : f32
    %98 = vector.broadcast %cst_48 : f32 to vector<8x8xf32>
    %99 = arith.mulf %97, %98 : vector<8x8xf32>
    %cst_49 = arith.constant -1.000000e+10 : f32
    %100 = vector.broadcast %cst_49 : f32 to vector<8x8xf32>
    %101 = arith.select %26, %99, %100 : vector<8x8xi1>, vector<8x8xf32>
    %cst_50 = arith.constant dense<0xFF800000> : vector<8xf32>
    %102 = vector.multi_reduction <maximumf>, %101, %cst_50 [1] : vector<8x8xf32> to vector<8xf32>
    %103 = vector.shape_cast %102 : vector<8xf32> to vector<8x1xf32>
    %104 = vector.broadcast %103 : vector<8x1xf32> to vector<8x8xf32>
    %105 = arith.subf %101, %104 : vector<8x8xf32>
    %106 = math.exp %105 : vector<8x8xf32>
    %cst_51 = arith.constant dense<0.000000e+00> : vector<8xf32>
    %107 = vector.multi_reduction <add>, %106, %cst_51 [1] : vector<8x8xf32> to vector<8xf32>
    %108 = vector.shape_cast %107 : vector<8xf32> to vector<8x1xf32>
    %109 = tpu.reciprocal %108 {approx = true} : vector<8x1xf32> -> vector<8x1xf32>
    %110 = vector.broadcast %109 : vector<8x1xf32> to vector<8x8xf32>
    %111 = arith.mulf %106, %110 : vector<8x8xf32>
    %cst_52 = arith.constant dense<0.000000e+00> : vector<8x8xf32>
    %112 = tpu.matmul %111, %96, %cst_52 {dimension_numbers = #tpu.dot_dimension_numbers<[1], [0], [0], [1], [0, 0, 1, 1], [], []>} : vector<8x8xf32>, vector<8x8xf32>, vector<8x8xf32> -> vector<8x8xf32>
    %c24 = arith.constant 24 : index
    %c0_53 = arith.constant 0 : index
    %113 = vector.load %arg7[%c24, %c0_53] : memref<32x32xf32, #tpu.memory_space<vmem>>, vector<8x32xf32>
    %cst_54 = arith.constant dense<0.000000e+00> : vector<8x32xf32>
    %114 = tpu.matmul %112, %113, %cst_54 {dimension_numbers = #tpu.dot_dimension_numbers<[1], [0], [0], [1], [0, 0, 1, 1], [], []>} : vector<8x8xf32>, vector<8x32xf32>, vector<8x32xf32> -> vector<8x32xf32>
    %115 = arith.addf %93, %114 : vector<8x32xf32>
    %c0_55 = arith.constant 0 : index
    %c0_56 = arith.constant 0 : index
    %116 = vector.load %arg8[%c0_55, %c0_56] : memref<1x32xf32, #tpu.memory_space<vmem>>, vector<1x32xf32>
    %117 = vector.broadcast %116 : vector<1x32xf32> to vector<8x32xf32>
    %118 = arith.addf %115, %117 : vector<8x32xf32>
    %119 = arith.addf %1, %118 : vector<8x32xf32>
    %cst_57 = arith.constant dense<0.000000e+00> : vector<8xf32>
    %120 = vector.multi_reduction <add>, %119, %cst_57 [1] : vector<8x32xf32> to vector<8xf32>
    %121 = vector.shape_cast %120 : vector<8xf32> to vector<8x1xf32>
    %cst_58 = arith.constant 3.200000e+01 : f32
    %122 = vector.broadcast %cst_58 : f32 to vector<8x1xf32>
    %123 = arith.divf %121, %122 : vector<8x1xf32>
    %124 = vector.broadcast %123 : vector<8x1xf32> to vector<8x32xf32>
    %125 = arith.subf %119, %124 : vector<8x32xf32>
    %126 = arith.mulf %125, %125 : vector<8x32xf32>
    %cst_59 = arith.constant dense<0.000000e+00> : vector<8xf32>
    %127 = vector.multi_reduction <add>, %126, %cst_59 [1] : vector<8x32xf32> to vector<8xf32>
    %128 = vector.shape_cast %127 : vector<8xf32> to vector<8x1xf32>
    %cst_60 = arith.constant 3.200000e+01 : f32
    %129 = vector.broadcast %cst_60 : f32 to vector<8x1xf32>
    %130 = arith.divf %128, %129 : vector<8x1xf32>
    %131 = vector.broadcast %123 : vector<8x1xf32> to vector<8x32xf32>
    %132 = arith.subf %119, %131 : vector<8x32xf32>
    %cst_61 = arith.constant 9.99999974E-6 : f32
    %133 = vector.broadcast %cst_61 : f32 to vector<8x1xf32>
    %134 = arith.addf %130, %133 : vector<8x1xf32>
    %135 = math.rsqrt %134 : vector<8x1xf32>
    %136 = vector.broadcast %135 : vector<8x1xf32> to vector<8x32xf32>
    %137 = arith.mulf %132, %136 : vector<8x32xf32>
    %c0_62 = arith.constant 0 : index
    %c0_63 = arith.constant 0 : index
    %138 = vector.load %arg9[%c0_62, %c0_63] : memref<1x32xf32, #tpu.memory_space<vmem>>, vector<1x32xf32>
    %139 = vector.broadcast %138 : vector<1x32xf32> to vector<8x32xf32>
    %140 = arith.mulf %137, %139 : vector<8x32xf32>
    %c0_64 = arith.constant 0 : index
    %c0_65 = arith.constant 0 : index
    %141 = vector.load %arg10[%c0_64, %c0_65] : memref<1x32xf32, #tpu.memory_space<vmem>>, vector<1x32xf32>
    %142 = vector.broadcast %141 : vector<1x32xf32> to vector<8x32xf32>
    %143 = arith.addf %140, %142 : vector<8x32xf32>
    %c0_66 = arith.constant 0 : index
    %c0_67 = arith.constant 0 : index
    %c0_68 = arith.constant 0 : index
    %144 = vector.load %arg11[%c0_66, %c0_67, %c0_68] : memref<1x8x32xf32, #tpu.memory_space<vmem>>, vector<1x8x32xf32>
    %145 = vector.shape_cast %144 : vector<1x8x32xf32> to vector<8x32xf32>
    %146 = vector.shape_cast %143 : vector<8x32xf32> to vector<1x8x32xf32>
    tpu.vector_store %arg11[%c0_66, %c0_67, %c0_68], %146 {strides = array<i32>} : memref<1x8x32xf32, #tpu.memory_space<vmem>>, vector<1x8x32xf32>,
    return
  }
  func.func @transform_0(%arg0: i32) -> (i32, i32, i32) {
    %c0_i32 = arith.constant 0 : i32
    %c0_i32_0 = arith.constant 0 : i32
    %c0_i32_1 = arith.constant 0 : i32
    return %arg0, %c0_i32, %c0_i32_0 : i32, i32, i32
  }
  func.func @transform_1(%arg0: i32) -> (i32, i32, i32) {
    %c0_i32 = arith.constant 0 : i32
    %c0_i32_0 = arith.constant 0 : i32
    %c0_i32_1 = arith.constant 0 : i32
    return %arg0, %c0_i32, %c0_i32_0 : i32, i32, i32
  }
  func.func @transform_2(%arg0: i32) -> (i32, i32, i32) {
    %c0_i32 = arith.constant 0 : i32
    %c0_i32_0 = arith.constant 0 : i32
    %c0_i32_1 = arith.constant 0 : i32
    return %arg0, %c0_i32, %c0_i32_0 : i32, i32, i32
  }
  func.func @transform_3(%arg0: i32) -> (i32, i32, i32) {
    %c0_i32 = arith.constant 0 : i32
    %c0_i32_0 = arith.constant 0 : i32
    %c0_i32_1 = arith.constant 0 : i32
    return %arg0, %c0_i32, %c0_i32_0 : i32, i32, i32
  }
  func.func @transform_4(%arg0: i32) -> (i32, i32) {
    %c0_i32 = arith.constant 0 : i32
    %c0_i32_0 = arith.constant 0 : i32
    %c0_i32_1 = arith.constant 0 : i32
    return %c0_i32, %c0_i32_0 : i32, i32
  }
  func.func @transform_5(%arg0: i32) -> (i32, i32) {
    %c0_i32 = arith.constant 0 : i32
    %c0_i32_0 = arith.constant 0 : i32
    %c0_i32_1 = arith.constant 0 : i32
    return %c0_i32, %c0_i32_0 : i32, i32
  }
  func.func @transform_6(%arg0: i32) -> (i32, i32) {
    %c0_i32 = arith.constant 0 : i32
    %c0_i32_0 = arith.constant 0 : i32
    %c0_i32_1 = arith.constant 0 : i32
    return %c0_i32, %c0_i32_0 : i32, i32
  }
  func.func @transform_7(%arg0: i32) -> (i32, i32) {
    %c0_i32 = arith.constant 0 : i32
    %c0_i32_0 = arith.constant 0 : i32
    %c0_i32_1 = arith.constant 0 : i32
    return %c0_i32, %c0_i32_0 : i32, i32
  }
  func.func @transform_8(%arg0: i32) -> (i32, i32) {
    %c0_i32 = arith.constant 0 : i32
    %c0_i32_0 = arith.constant 0 : i32
    %c0_i32_1 = arith.constant 0 : i32
    return %c0_i32, %c0_i32_0 : i32, i32
  }
  func.func @transform_9(%arg0: i32) -> (i32, i32) {
    %c0_i32 = arith.constant 0 : i32
    %c0_i32_0 = arith.constant 0 : i32
    %c0_i32_1 = arith.constant 0 : i32
    return %c0_i32, %c0_i32_0 : i32, i32
  }
  func.func @transform_10(%arg0: i32) -> (i32, i32, i32) {
    %c0_i32 = arith.constant 0 : i32
    %c0_i32_0 = arith.constant 0 : i32
    %c0_i32_1 = arith.constant 0 : i32
    return %arg0, %c0_i32, %c0_i32_0 : i32, i32, i32
  }
}

</mosaic_0001>

<bundles_post_ra>
// kernel: decoder_forward.13
= control target key start
LH: loop header
LB: loop body
LE: loop exit
PB: predicated region body
PF: predicated region fallthrough
CT: control target
= control target key end

     0   :  { %s159_s0 = inlined_call_operand.vmem [shape: f32[16,32], index: 0, kind: input, shape index: {}]   ;;  %s160_s1 = inlined_call_operand.vmem [shape: f32[32,50], index: 1, kind: input, shape index: {}]   ;;  %s161_s2 = inlined_call_operand.vmem [shape: f32[1,50], index: 2, kind: input, shape index: {}]   ;;  %s162_s3 = inlined_call_operand.hbm [shape: f32[16,50], index: 3, kind: output, shape index: {}]  }
   0x1   :  { %v20_v0 = vld [vmem:[%s160_s1 + $0x18] sm:$0xff]  ;;  %v19_v1 = vld [vmem:[%s160_s1 + $0x10] sm:$0xff]  ;;  %v18_v2 = vld [vmem:[%s160_s1 + $0x8] sm:$0xff] }
   0x2   :  { %44 = vmatpush.msra.mxu0 %v20_v0  ;;  %78 = vmatpush.msra.mxu1 %v20_v0 }
   0x3   :  { %8 = vsyncpa [#allocation3], 0  ;;  %v17_v3 = vld [vmem:[%s160_s1] sm:$0xff]  ;;  %vm25_vm0 = vcmask 261120   ;;  %v16_v5 = vld [vmem:[%s159_s0 + $0x8] sm:$0xff]  ;;  %s112_s1 = smov [#allocation2]  }
   0x4   :  { %45 = vmatpush.msra.mxu0 %v19_v1  ;;  %79 = vmatpush.msra.mxu1 %v19_v1  ;;  %v15_v4 = vld [vmem:[%s159_s0] sm:$0xff]  ;;  %s62_s26 = sshll.u32 %s112_s1, 4  ;;  %s64_s29 = sshll.u32 %s162_s3, 4  ;;  %vm55_vm1 = vcmask 408576   ;;  %s63_s26 = int_to_ptr.vmem [resolvable:$true] %s62_s26  ;;  %s65_s29 = int_to_ptr.hbm [resolvable:$true] %s64_s29 }
   0x5   :  { %v85_v6 = vld [vmem:[%s161_s2] ss:$0 sm:$0xff]  ;;  %s113_s0 = smov 128   ;;  %s114_s30 = smov 8  }
   0x6   :  { %46 = vmatpush.msra.mxu0 %v18_v2  ;;  %80 = vmatpush.msra.mxu1 %v18_v2 }
   0x8   :  { %47 = vmatpush.msra.mxu0 %v17_v3  ;;  %81 = vmatpush.msra.mxu1 %v17_v3 }
   0x9   :  { %76 = vmatmul.msk.f32.vlgmr.msra.gmra.mxu0 %vm25_vm0, %v15_v4  ;;  %77 = vmatmul.msk.f32.vlgmr.msra.gmra.mxu1 %vm25_vm0, %v16_v5 }
  0x86   :  { %v49_v7 = vpop.f32.mrf.mxu0  ;;  %v52_v8 = vpop.f32.mrf.mxu1 }
  0x87   :  { %v50_v9 = vadd.f32 %v85_v6, %v49_v7  ;;  %v53_v10 = vadd.f32 %v85_v6, %v52_v8 }
  0x89   :  { %56 = vst.msk [vmem:[#allocation2] sm:$0xff] %vm55_vm1, %v50_v9 }
  0x8a   :  { %57 = vst.msk [vmem:[#allocation2 + $0x8] sm:$0xff] %vm55_vm1, %v53_v10 }
  0x8b   :  { %70 = dma.vmem_to_hbm [thread:$0]  %s63_s26, 256, %s65_s29, [#allocation3], %s113_s0, %s113_s0, %s114_s30  }
  0x8c   :  { %110 = dma.done.wait [#allocation3], 256  }
  0x8d   :  { %111 = vsyncadd [#allocation3], 4294967040 }
  0x8e   :  { %75 = vsyncpa [#allocation3], 1 }

// kernel: decoder_forward.9
= control target key start
LH: loop header
LB: loop body
LE: loop exit
PB: predicated region body
PF: predicated region fallthrough
CT: control target
= control target key end

     0   :  { %vm36_vm0 = vcmask 261120   ;;  %vm80_vm1 = vcmask 523264   ;;  %v208_v30 = vmov 32.0   ;;  %s317_s1 = inlined_call_operand.vmem [shape: f32[32,64], index: 1, kind: input, shape index: {}]   ;;  %s318_s3 = inlined_call_operand.vmem [shape: f32[64,32], index: 3, kind: input, shape index: {}]   ;;  %s319_s0 = inlined_call_operand.vmem [shape: f32[16,32], index: 0, kind: input, shape index: {}]   ;;  %s320_s2 = inlined_call_operand.vmem [shape: f32[1,64], index: 2, kind: input, shape index: {}]   ;;  %s321_s4 = inlined_call_operand.vmem [shape: f32[1,32], index: 4, kind: input, shape index: {}]   ;;  %s322_s5 = inlined_call_operand.vmem [shape: f32[1,32], index: 5, kind: input, shape index: {}]   ;;  %s323_s6 = inlined_call_operand.vmem [shape: f32[1,32], index: 6, kind: input, shape index: {}]   ;;  %s324_s7 = inlined_call_operand.vmem [shape: f32[16,32], index: 7, kind: output, shape index: {}]  }
   0x1   :  { %v31_v0 = vld [vmem:[%s317_s1 + $0x18] sm:$0xff]  ;;  %v30_v1 = vld [vmem:[%s317_s1 + $0x10] sm:$0xff]  ;;  %v29_v2 = vld [vmem:[%s317_s1 + $0x8] sm:$0xff]  ;;  %202 = vrcp.f32 %v208_v30 }
   0x2   :  { %55 = vmatpush.msra.mxu0 %v31_v0  ;;  %185 = vmatpush.msra.mxu3 %v31_v0  ;;  %v75_v3 = vld [vmem:[%s318_s3 + $0x38] sm:$0xff]  ;;  %v74_v4 = vld [vmem:[%s318_s3 + $0x30] sm:$0xff]  ;;  %v28_v5 = vld [vmem:[%s317_s1] sm:$0xff] }
   0x3   :  { %95 = vmatpush.msra.mxu1 %v75_v3  ;;  %189 = vmatpush.msra.mxu2 %v75_v3  ;;  %v26_v6 = vld [vmem:[%s319_s0] sm:$0xff]  ;;  %v27_v7 = vld [vmem:[%s319_s0 + $0x8] sm:$0xff]  ;;  %v71_v10 = vld [vmem:[%s318_s3 + $0x18] sm:$0xff] }
   0x4   :  { %56 = vmatpush.msra.mxu0 %v30_v1  ;;  %186 = vmatpush.msra.mxu3 %v30_v1  ;;  %v73_v8 = vld [vmem:[%s318_s3 + $0x28] sm:$0xff]  ;;  %v72_v9 = vld [vmem:[%s318_s3 + $0x20] sm:$0xff]  ;;  %v70_v11 = vld [vmem:[%s318_s3 + $0x10] sm:$0xff] }
   0x5   :  { %96 = vmatpush.msra.mxu1 %v74_v4  ;;  %190 = vmatpush.msra.mxu2 %v74_v4  ;;  %v69_v12 = vld [vmem:[%s318_s3 + $0x8] sm:$0xff]  ;;  %v68_v13 = vld [vmem:[%s318_s3] sm:$0xff] }
   0x6   :  { %57 = vmatpush.msra.mxu0 %v29_v2  ;;  %187 = vmatpush.msra.mxu3 %v29_v2  ;;  %v198_v14 = vld [vmem:[%s320_s2] ss:$0 sm:$0xff] }
   0x7   :  { %97 = vmatpush.msra.mxu1 %v73_v8  ;;  %191 = vmatpush.msra.mxu2 %v73_v8  ;;  %v199_v21 = vld [vmem:[%s321_s4] ss:$0 sm:$0xff]  ;;  %v203_v31 = vpop.eup %202 }
   0x8   :  { %58 = vmatpush.msra.mxu0 %v28_v5  ;;  %188 = vmatpush.msra.mxu3 %v28_v5  ;;  %v119_v32 = vmul.f32 32.0, %v203_v31  ;;  %vm123_vm2 = vweird.f32 %v203_v31  ;;  %v200_v59 = vld [vmem:[%s322_s5] ss:$0 sm:$0xff] }
   0x9   :  { %181 = vmatmul.msk.f32.vlgmr.msra.gmra.mxu0 %vm36_vm0, %v26_v6  ;;  %182 = vmatmul.msk.f32.vlgmr.msra.gmra.mxu3 %vm36_vm0, %v27_v7  ;;  %v201_v62 = vld [vmem:[%s323_s6] ss:$0 sm:$0xff] }
   0xa   :  { %98 = vmatpush.msra.mxu1 %v72_v9  ;;  %192 = vmatpush.msra.mxu2 %v72_v9  ;;  %v120_v33 = vsub.f32 1.0, %v119_v32 }
   0xc   :  { %99 = vmatpush.msra.mxu1 %v71_v10  ;;  %193 = vmatpush.msra.mxu2 %v71_v10  ;;  %v121_v34 = vmul.f32 %v203_v31, %v120_v33 }
   0xe   :  { %100 = vmatpush.msra.mxu1 %v70_v11  ;;  %194 = vmatpush.msra.mxu2 %v70_v11  ;;  %v122_v35 = vadd.f32 %v203_v31, %v121_v34 }
  0x10   :  { %101 = vmatpush.msra.mxu1 %v69_v12  ;;  %195 = vmatpush.msra.mxu2 %v69_v12  ;;  %v124_v36 = vsel %vm123_vm2, %v203_v31, %v122_v35 }
  0x12   :  { %102 = vmatpush.msra.mxu1 %v68_v13  ;;  %196 = vmatpush.msra.mxu2 %v68_v13 }
  0x86   :  { %v60_v15 = vpop.f32.mrf.mxu0 }
  0x87   :  { %v61_v16 = vadd.f32 %v198_v14, %v60_v15 }
  0x89   :  { %v66_v17 = vmax.f32 %v61_v16, 0.0 }
  0x8b   :  { %183 = vmatmul.msk.f32.vlgmr.msra.gmra.mxu1 %vm80_vm1, %v66_v17 }
  0x8c   :  { %v63_v18 = vpop.f32.mrf.mxu3 }
  0x8d   :  { %v64_v19 = vadd.f32 %v198_v14, %v63_v18 }
  0x8f   :  { %v67_v20 = vmax.f32 %v64_v19, 0.0 }
  0x91   :  { %184 = vmatmul.msk.f32.vlgmr.msra.gmra.mxu2 %vm80_vm1, %v67_v20 }
 0x108   :  { %v104_v22 = vpop.f32.mrf.mxu1 }
 0x109   :  { %v105_v23 = vadd.f32 %v199_v21, %v104_v22 }
 0x10b   :  { %v110_v24 = vadd.f32 %v105_v23, %v26_v6 }
 0x10d   :  { %v112_v25 = vsel %vm36_vm0, %v110_v24, 0.0 }
 0x10e   :  { %113 = vadd.xlane.f32.xlu0 %v112_v25 }
 0x114   :  { %v107_v26 = vpop.f32.mrf.mxu2 }
 0x115   :  { %v108_v27 = vadd.f32 %v199_v21, %v107_v26 }
 0x117   :  { %v111_v28 = vadd.f32 %v108_v27, %v27_v7 }
 0x119   :  { %v115_v29 = vsel %vm36_vm0, %v111_v28, 0.0 }
 0x11a   :  { %116 = vadd.xlane.f32.xlu0 %v115_v29 }
 0x181   :  { %v114_v37 = vpop.xlane.xlu0 %113 }
 0x182   :  { %v125_v38 = vmul.f32 %v124_v36, %v114_v37 }
 0x184   :  { %v127_v39 = vsub.f32 %v110_v24, %v125_v38 }
 0x186   :  { %v129_v40 = vmul.f32 %v127_v39, %v127_v39 }
 0x188   :  { %v131_v41 = vsel %vm36_vm0, %v129_v40, 0.0 }
 0x189   :  { %132 = vadd.xlane.f32.xlu1 %v131_v41 }
 0x18d   :  { %v117_v42 = vpop.xlane.xlu0 %116 }
 0x18e   :  { %v126_v43 = vmul.f32 %v124_v36, %v117_v42 }
 0x190   :  { %v128_v44 = vsub.f32 %v111_v28, %v126_v43 }
 0x192   :  { %v130_v45 = vmul.f32 %v128_v44, %v128_v44 }
 0x194   :  { %v134_v46 = vsel %vm36_vm0, %v130_v45, 0.0 }
 0x195   :  { %135 = vadd.xlane.f32.xlu1 %v134_v46 }
 0x1fc   :  { %v133_v47 = vpop.xlane.xlu1 %132 }
 0x1fd   :  { %v137_v48 = vmul.f32 %v133_v47, %v124_v36 }
 0x1ff   :  { %v139_v49 = vadd.f32 1e-05, %v137_v48 }
 0x201   :  { %204 = vrsqrt.f32 %v139_v49  ;;  %vm147_vm4 = vweird.f32 %v139_v49 }
 0x207   :  { %v205_v50 = vpop.eup %204 }
 0x208   :  { %v142_v51 = vmul.f32 %v205_v50, %v139_v49  ;;  %v136_v52 = vpop.xlane.xlu1 %135  ;;  %vm148_vm3 = vweird.f32 %v205_v50 }
 0x209   :  { %v138_v53 = vmul.f32 %v136_v52, %v124_v36  ;;  %vm149_vm5 = vmor %vm147_vm4, %vm148_vm3 }
 0x20a   :  { %v143_v54 = vmul.f32 %v205_v50, %v142_v51 }
 0x20b   :  { %v140_v55 = vadd.f32 1e-05, %v138_v53 }
 0x20c   :  { %v144_v56 = vmul.f32 0.5, %v143_v54 }
 0x20d   :  { %206 = vrsqrt.f32 %v140_v55  ;;  %vm157_vm7 = vweird.f32 %v140_v55 }
 0x20e   :  { %v145_v57 = vsub.f32 1.5, %v144_v56 }
 0x210   :  { %v146_v58 = vmul.f32 %v205_v50, %v145_v57 }
 0x212   :  { %v150_v60 = vsel %vm149_vm5, %v205_v50, %v146_v58 }
 0x213   :  { %v207_v61 = vpop.eup %206  ;;  %v161_v63 = vmul.f32 %v150_v60, %v127_v39 }
 0x214   :  { %v152_v0 = vmul.f32 %v207_v61, %v140_v55  ;;  %vm158_vm6 = vweird.f32 %v207_v61 }
 0x215   :  { %v167_v1 = vmul.f32 %v200_v59, %v161_v63  ;;  %vm159_vm8 = vmor %vm157_vm7, %vm158_vm6 }
 0x216   :  { %v153_v2 = vmul.f32 %v207_v61, %v152_v0 }
 0x217   :  { %v173_v3 = vadd.f32 %v201_v62, %v167_v1 }
 0x218   :  { %v154_v4 = vmul.f32 0.5, %v153_v2 }
 0x219   :  { %175 = vst.msk [vmem:[%s324_s7] sm:$0xff] %vm36_vm0, %v173_v3 }
 0x21a   :  { %v155_v5 = vsub.f32 1.5, %v154_v4 }
 0x21c   :  { %v156_v6 = vmul.f32 %v207_v61, %v155_v5 }
 0x21e   :  { %v160_v7 = vsel %vm159_vm8, %v207_v61, %v156_v6 }
 0x21f   :  { %v162_v8 = vmul.f32 %v160_v7, %v128_v44 }
 0x221   :  { %v168_v9 = vmul.f32 %v200_v59, %v162_v8 }
 0x223   :  { %v174_v10 = vadd.f32 %v201_v62, %v168_v9 }
 0x225   :  { %176 = vst.msk [vmem:[%s324_s7 + $0x8] sm:$0xff] %vm36_vm0, %v174_v10 }

// kernel: decoder_forward.7
= control target key start
LH: loop header
LB: loop body
LE: loop exit
PB: predicated region body
PF: predicated region fallthrough
CT: control target
= control target key end

     0   :  { %s1102_s12 = smov 0   ;;  %s1231_s0 = inlined_call_operand.vmem [shape: f32[2,8,32], index: 0, kind: input, shape index: {}, may-alias: {0,1}]   ;;  %s1232_s1 = inlined_call_operand.vmem [shape: f32[2,8,32], index: 1, kind: input, shape index: {}, may-alias: {0,1}]   ;;  %s1233_s2 = inlined_call_operand.vmem [shape: f32[2,8,1], index: 2, kind: input, shape index: {}]   ;;  %s1234_s3 = inlined_call_operand.vmem [shape: f32[2,1,8], index: 3, kind: input, shape index: {}]   ;;  %s1235_s4 = inlined_call_operand.vmem [shape: f32[32,96], index: 4, kind: input, shape index: {}]   ;;  %s1236_s5 = inlined_call_operand.vmem [shape: f32[1,96], index: 5, kind: input, shape index: {}]   ;;  %s1237_s6 = inlined_call_operand.vmem [shape: f32[32,32], index: 6, kind: input, shape index: {}]   ;;  %s1238_s7 = inlined_call_operand.vmem [shape: f32[1,32], index: 7, kind: input, shape index: {}]   ;;  %s1239_s8 = inlined_call_operand.vmem [shape: f32[1,32], index: 8, kind: input, shape index: {}]   ;;  %s1240_s9 = inlined_call_operand.vmem [shape: f32[1,32], index: 9, kind: input, shape index: {}]   ;;  %s1241_s10 = inlined_call_operand.vmem [shape: f32[2,8,32], index: 10, kind: output, shape index: {}]  }
   0x1 LB: > { %s953_s13 = sadd.s32 4294967295, %s1032_s12   ;;  %p957_p0 = scmp.ge.s32.totalorder %s1032_s12, 1  ;;  %s1032_s12 = sphi %s1102_s12, %s20_s12  }
   0x2   : > { %p337_p1 = scmp.lt.s32.totalorder %s1032_s12, 3 }
   0x4   : > { %p338_p2 = pnand %p957_p0, %p337_p1 }
   0x5   : > { %p384_p3 = scmp.lt.s32.totalorder (!%p338_p2), %s953_s13, 1  ;;  %s1035_s30 = smov (!%p338_p2), 64  }
   0x6   : > { %341 = sbr.rel (%p338_p2) target bundleno = 1726 (0x6be), region = 60  ;;  %s1036_s11 = smov (!%p338_p2), 96  }
   0x7   : > { %s1037_s14 = smov (!%p338_p2), 88   ;;  %s1038_s15 = smov (!%p338_p2), 72  }
   0x8   : > { %s1039_s16 = smov (!%p338_p2), 104   ;;  %s1040_s17 = smov (!%p338_p2), 80  }
   0x9   : > { %s1041_s18 = smov (!%p338_p2), 112   ;;  %s1043_s23 = smov (!%p338_p2), 120  }
   0xa   : > { %s1044_s26 = smov (!%p338_p2), 48   ;;  %s1045_s27 = smov (!%p338_p2), 40  }
   0xb   : > { %v407_v0 = vld [vmem:[%s1235_s4 + $0x18] sm:$0xff]  ;;  %v406_v1 = vld [vmem:[%s1235_s4 + $0x10] sm:$0xff]  ;;  %v405_v2 = vld [vmem:[%s1235_s4 + $0x8] sm:$0xff]  ;;  %s1245_s13 = smov (!%p384_p3, %s953_s13), 1  ;;  %vm412_vm0 = vcmask 261120   ;;  %v1034_v5 = vmov 0   ;;  %v449_v21 = vlaneseq }
   0xc   : > { %428 = vmatpush.msra.mxu0 %v407_v0  ;;  %v404_v3 = vld [vmem:[%s1235_s4] sm:$0xff]  ;;  %s1125_s22 = sshll.u32 %s1245_s13, 3  ;;  %1001 = vset.pattern.permute.xlu0 %v1034_v5  ;;  %vm458_vm2 = vcmask 64512   ;;  %s398_s21 = scalar_lea.vmem %s1234_s3, %s1245_s13 }
   0xd   : > { %s387_s25 = scalar_lea.vmem %s1231_s0, %s1125_s22  ;;  %v1002_v6 = vld [vmem:[%s1236_s5] ss:$0 sm:$0xff]  ;;  %s395_s29 = scalar_lea.vmem %s1233_s2, %s1125_s22  ;;  %v450_v23 = vshrl.u32 %v449_v21, 7  ;;  %v452_v24 = vand.u32 127, %v449_v21 }
   0xe   : > { %429 = vmatpush.msra.mxu0 %v406_v1  ;;  %v1131_v4 = vld [vmem:[%s387_s25] sm:$0xff]  ;;  %s1042_s13 = smov 56  }
   0xf   : > { %v436_v9 = vld [vmem:[%s395_s29] sm:$0xff]  ;;  %vm453_vm6 = vcmp.le.s32.totalorder %v452_v24, %v450_v23 }
  0x10   : > { %430 = vmatpush.msra.mxu0 %v405_v2  ;;  %vm438_vm1 = vcmp.gt.f32.partialorder %v436_v9, 0.5  ;;  %v437_v19 = vld [vmem:[%s398_s21] sm:$0x1] }
  0x11   : > { %v440_v10 = vsel %vm438_vm1, 1, %v1034_v5  ;;  %vm439_vm3 = vcmp.gt.f32.partialorder %v437_v19, 0.5  ;;  %v522_v41 = vld [vmem:[%s1237_s6] sm:$0xff] }
  0x12   : > { %431 = vmatpush.msra.mxu0 %v404_v3  ;;  %v445_v20 = vsel %vm439_vm3, 1, %v1034_v5 }
  0x13   : > { %961 = vmatmul.msk.f32.vlgmr.msra.gmra.mxu0 %vm412_vm0, %v1131_v4  ;;  %v446_v22 = vperm.slane %v445_v20, 0 }
  0x15   : > { %vm447_vm4 = vcmp.eq.s32.totalorder %v446_v22, 1 }
  0x90   : > { %v433_v7 = vpop.f32.mrf.mxu0 }
  0x91   : > { %v1142_v8 = vadd.f32 %v1002_v6, %v433_v7 }
  0x93   : > { %496 = vrot.lane.b32.xlu2 %v1142_v8, %s1035_s30  ;;  %456 = vrot.lane.b32.xlu0 %v1142_v8, %s1036_s11 }
  0x9b   : > { %525 = vrot.lane.b32.xlu2 %v1142_v8, %s1037_s14  ;;  %442 = vperm.xlu0 %1001, %v440_v10  }
  0xa3   : > { %731 = vrot.lane.b32.xlu2 %v1142_v8, %s1038_s15  ;;  %729 = vrot.lane.b32.xlu0 %v1142_v8, %s1039_s16 }
  0xab   : > { %639 = vrot.lane.b32.xlu2 %v1142_v8, %s1040_s17  ;;  %637 = vrot.lane.b32.xlu0 %v1142_v8, %s1041_s18 }
  0xed   : > { %v497_v11 = vpop.permute.xlu2 %496 }
  0xee   : > { %517 = vmatpush.msra.mxu2 %v497_v11 }
  0xf5   : > { %v526_v12 = vpop.permute.xlu2 %525 }
  0xf6   : > { %965 = vmatpush.xpose.msk.msra.mxu3 %vm458_vm2, %v526_v12 }
  0xfa   : > { %632 = vmatpush.msrb.mxu3 %v522_v41 }
  0xfd   : > { %v732_v13 = vpop.permute.xlu2 %731 }
 0x105   : > { %v640_v14 = vpop.permute.xlu2 %639  ;;  %v457_v15 = vpop.permute.xlu0 %456 }
 0x106   : > { %962 = vmatpush.xpose.msk.msra.mxu1 %vm458_vm2, %v457_v15  ;;  %970 = vmatpush.xpose.msk.msrb.mxu0 %vm458_vm2, %v640_v14  ;;  %v590_v15 = vld [vmem:[%s1237_s6 + $0x8] sm:$0xff] }
 0x109   : > { %963 = vmatmul.msk.f32.vlgmr.msra.gmra.mxu1 %vm458_vm2, %v1142_v8 }
 0x10a   : > { %609 = vmatpush.msrb.mxu1 %v590_v15 }
 0x10d   : > { %v443_v16 = vpop.permute.xlu0 %442 }
 0x10e   : > { %vm444_vm5 = vcmp.eq.s32.totalorder %v443_v16, 1  ;;  %v704_v16 = vld [vmem:[%s1237_s6 + $0x10] sm:$0xff] }
 0x10f   : > { %vm448_vm7 = vmand %vm444_vm5, %vm447_vm4  ;;  %723 = vmatpush.msra.mxu1 %v704_v16 }
 0x110   : > { %vm1161_vm8 = vmand %vm448_vm7, %vm453_vm6 }
 0x115   : > { %v730_v17 = vpop.permute.xlu0 %729 }
 0x11d   : > { %v638_v18 = vpop.permute.xlu0 %637 }
 0x11e   : > { %971 = vmatmul.msk.f32.vlgmr.msrb.gmra.mxu0 %vm458_vm2, %v638_v18 }
 0x186   : > { %v480_v26 = vpop.f32.mrf.mxu1 }
 0x187   : > { %v483_v27 = vmul.f32 0.35355338, %v480_v26 }
 0x189   : > { %v484_v28 = vsel %vm1161_vm8, %v483_v27, -1e+10 }
 0x18a   : > { %v485_v29 = vsel %vm458_vm2, %v484_v28, -inf }
 0x18b   : > { %486 = vmax.xlane.f32.xlu1 %v485_v29 }
 0x19b   : > { %v662_v30 = vpop.f32.mrf.mxu0 }
 0x19c   : > { %v665_v31 = vmul.f32 0.35355338, %v662_v30 }
 0x19e   : > { %v666_v32 = vsel %vm1161_vm8, %v665_v31, -1e+10 }
 0x19f   : > { %v667_v33 = vsel %vm458_vm2, %v666_v32, -inf }
 0x1a0   : > { %668 = vmax.xlane.f32.xlu0 %v667_v33 }
 0x1b4   : > { %564 = vrot.lane.b32.xlu0 %v1142_v8, %s1042_s13 }
 0x1fe   : > { %v487_v34 = vpop.xlane.xlu1 %486 }
 0x1ff   : > { %v488_v35 = vsub.f32 %v484_v28, %v487_v34  ;;  %v1003_v28 = vld [vmem:[%s1238_s7] ss:$0 sm:$0xff]  ;;  %v1046_v34 = vmov 32.0  }
 0x201   : > { %v489_v36 = vmul.f32 1.442695, %v488_v35 }
 0x203   : > { %1006 = vpow2.f32 %v489_v36 }
 0x209   : > { %v1007_v37 = vpop.eup %1006 }
 0x20a   : > { %v491_v38 = vsel %vm458_vm2, %v1007_v37, 0.0 }
 0x20b   : > { %492 = vadd.xlane.f32.xlu1 %v491_v38 }
 0x213   : > { %v669_v39 = vpop.xlane.xlu0 %668 }
 0x214   : > { %v670_v54 = vsub.f32 %v666_v32, %v669_v39 }
 0x216   : > { %v671_v58 = vmul.f32 1.442695, %v670_v54  ;;  %v1004_v54 = vld [vmem:[%s1239_s8] ss:$0 sm:$0xff] }
 0x224   : > { %523 = vrot.lane.b32.xlu1 %v1142_v8, %s1043_s23  ;;  %s402_s23 = scalar_lea.vmem %s1241_s10, %s1125_s22 }
 0x226   : > { %v565_v40 = vpop.permute.xlu0 %564 }
 0x227   : > { %585 = vmatpush.msrb.mxu2 %v565_v40 }
 0x27e   : > { %v493_v42 = vpop.xlane.xlu1 %492 }
 0x27f   : > { %1008 = vrcp.f32 %v493_v42 }
 0x285   : > { %v1009_v43 = vpop.eup %1008 }
 0x286   : > { %v495_v44 = vmul.f32 %v1009_v43, %v1007_v37 }
 0x288   : > { %964 = vmatmul.msk.f32.vlgmr.msra.gmra.mxu2 %vm458_vm2, %v495_v44 }
 0x296   : > { %v524_v45 = vpop.permute.xlu1 %523 }
 0x297   : > { %966 = vmatmul.msk.f32.vlgmr.msra.gmra.mxu3 %vm458_vm2, %v524_v45 }
 0x298   : > { %974 = vmatpush.xpose.msk.msra.mxu3 %vm458_vm2, %v732_v13 }
 0x30b   : > { %v519_v46 = vpop.f32.mrf.mxu2 }
 0x30c   : > { %969 = vmatmul.msk.f32.vlgmr.msrb.gmra.mxu3 %vm458_vm2, %v519_v46 }
 0x314   : > { %975 = vmatmul.msk.f32.vlgmr.msra.gmra.mxu3 %vm458_vm2, %v730_v17 }
 0x31a   : > { %v548_v47 = vpop.f32.mrf.mxu3 }
 0x31b   : > { %v551_v48 = vmul.f32 0.35355338, %v548_v47 }
 0x31d   : > { %v552_v49 = vsel %vm1161_vm8, %v551_v48, -1e+10 }
 0x31e   : > { %v553_v50 = vsel %vm458_vm2, %v552_v49, -inf }
 0x31f   : > { %554 = vmax.xlane.f32.xlu2 %v553_v50 }
 0x38f   : > { %v1185_v51 = vpop.f32.mrf.mxu3 }
 0x392   : > { %v555_v52 = vpop.xlane.xlu2 %554 }
 0x393   : > { %v556_v53 = vsub.f32 %v552_v49, %v555_v52 }
 0x395   : > { %v557_v55 = vmul.f32 1.442695, %v556_v53 }
 0x397   : > { %1010 = vpow2.f32 %v557_v55  ;;  %v754_v56 = vpop.f32.mrf.mxu3 }
 0x398   : > { %v757_v57 = vmul.f32 0.35355338, %v754_v56  ;;  %1012 = vpow2.f32 %v671_v58  ;;  %v1005_v56 = vld [vmem:[%s1240_s9] ss:$0 sm:$0xff] }
 0x39a   : > { %v758_v59 = vsel %vm1161_vm8, %v757_v57, -1e+10 }
 0x39b   : > { %v759_v60 = vsel %vm458_vm2, %v758_v59, -inf }
 0x39c   : > { %760 = vmax.xlane.f32.xlu1 %v759_v60 }
 0x39d   : > { %v1011_v61 = vpop.eup %1010 }
 0x39e   : > { %v559_v62 = vsel %vm458_vm2, %v1011_v61, 0.0  ;;  %v1013_v63 = vpop.eup %1012 }
 0x39f   : > { %560 = vadd.xlane.f32.xlu2 %v559_v62  ;;  %v673_v0 = vsel %vm458_vm2, %v1013_v63, 0.0 }
 0x3a7   : > { %674 = vadd.xlane.f32.xlu2 %v673_v0 }
 0x3bf   : > { %678 = vrot.lane.b32.xlu2 %v1142_v8, %s1044_s26 }
 0x40f   : > { %v761_v1 = vpop.xlane.xlu1 %760 }
 0x410   : > { %v762_v2 = vsub.f32 %v758_v59, %v761_v1 }
 0x412   : > { %v763_v3 = vmul.f32 1.442695, %v762_v2  ;;  %v561_v5 = vpop.xlane.xlu2 %560 }
 0x413   : > { %1014 = vrcp.f32 %v561_v5 }
 0x414   : > { %1016 = vpow2.f32 %v763_v3 }
 0x419   : > { %v1015_v6 = vpop.eup %1014 }
 0x41a   : > { %v1017_v7 = vpop.eup %1016  ;;  %v675_v9 = vpop.xlane.xlu2 %674  ;;  %v563_v10 = vmul.f32 %v1015_v6, %v1011_v61 }
 0x41b   : > { %1018 = vrcp.f32 %v675_v9  ;;  %v765_v11 = vsel %vm458_vm2, %v1017_v7, 0.0 }
 0x41c   : > { %766 = vadd.xlane.f32.xlu1 %v765_v11  ;;  %967 = vmatmul.msk.f32.vlgmr.msrb.gmra.mxu2 %vm458_vm2, %v563_v10 }
 0x421   : > { %v1019_v12 = vpop.eup %1018 }
 0x422   : > { %v677_v13 = vmul.f32 %v1019_v12, %v1013_v63  ;;  %v679_v14 = vpop.permute.xlu2 %678 }
 0x423   : > { %699 = vmatpush.msra.mxu2 %v679_v14 }
 0x424   : > { %972 = vmatmul.msk.f32.vlgmr.msra.gmra.mxu2 %vm458_vm2, %v677_v13 }
 0x435   : > { %770 = vrot.lane.b32.xlu1 %v1142_v8, %s1045_s27  ;;  %v796_v8 = vld [vmem:[%s1237_s6 + $0x18] sm:$0xff] }
 0x436   : > { %815 = vmatpush.msrb.mxu2 %v796_v8 }
 0x48f   : > { %v767_v17 = vpop.xlane.xlu1 %766 }
 0x490   : > { %1020 = vrcp.f32 %v767_v17 }
 0x491   : > { %1022 = vrcp.f32 %v1046_v34 }
 0x496   : > { %v1021_v19 = vpop.eup %1020 }
 0x497   : > { %v769_v20 = vmul.f32 %v1021_v19, %v1017_v7  ;;  %v1023_v35 = vpop.eup %1022 }
 0x498   : > { %v831_v36 = vmul.f32 32.0, %v1023_v35  ;;  %vm835_vm9 = vweird.f32 %v1023_v35 }
 0x49a   : > { %v832_v37 = vsub.f32 1.0, %v831_v36 }
 0x49c   : > { %v833_v38 = vmul.f32 %v1023_v35, %v832_v37 }
 0x49e   : > { %v834_v39 = vadd.f32 %v1023_v35, %v833_v38 }
 0x49f   : > { %v587_v18 = vpop.f32.mrf.mxu2 }
 0x4a0   : > { %968 = vmatmul.msk.f32.vlgmr.msrb.gmra.mxu1 %vm458_vm2, %v587_v18  ;;  %v836_v40 = vsel %vm835_vm9, %v1023_v35, %v834_v39 }
 0x4a7   : > { %v771_v21 = vpop.permute.xlu1 %770  ;;  %v701_v22 = vpop.f32.mrf.mxu2 }
 0x4a8   : > { %973 = vmatmul.msk.f32.vlgmr.msra.gmra.mxu1 %vm458_vm2, %v701_v22  ;;  %791 = vmatpush.msra.mxu0 %v771_v21 }
 0x4a9   : > { %976 = vmatmul.msk.f32.vlgmr.msra.gmra.mxu0 %vm458_vm2, %v769_v20 }
 0x51d   : > { %v611_v24 = vpop.f32.mrf.mxu1 }
 0x51e   : > { %v635_v26 = vadd.f32 %v1185_v51, %v611_v24 }
 0x525   : > { %v725_v25 = vpop.f32.mrf.mxu1 }
 0x526   : > { %v793_v23 = vpop.f32.mrf.mxu0  ;;  %v728_v27 = vadd.f32 %v725_v25, %v635_v26 }
 0x527   : > { %977 = vmatmul.msk.f32.vlgmr.msrb.gmra.mxu2 %vm458_vm2, %v793_v23 }
 0x5aa   : > { %v817_v29 = vpop.f32.mrf.mxu2 }
 0x5ab   : > { %v820_v30 = vadd.f32 %v817_v29, %v728_v27 }
 0x5ad   : > { %v825_v31 = vadd.f32 %v1003_v28, %v820_v30 }
 0x5af   : > { %v826_v32 = vadd.f32 %v825_v31, %v1131_v4 }
 0x5b1   : > { %v827_v33 = vsel %vm412_vm0, %v826_v32, 0.0 }
 0x5b2   : > { %828 = vadd.xlane.f32.xlu0 %v827_v33 }
 0x625   : > { %v829_v41 = vpop.xlane.xlu0 %828 }
 0x626   : > { %v837_v42 = vmul.f32 %v836_v40, %v829_v41 }
 0x628   : > { %v838_v43 = vsub.f32 %v826_v32, %v837_v42 }
 0x62a   : > { %v839_v44 = vmul.f32 %v838_v43, %v838_v43 }
 0x62c   : > { %v840_v45 = vsel %vm412_vm0, %v839_v44, 0.0 }
 0x62d   : > { %841 = vadd.xlane.f32.xlu2 %v840_v45 }
 0x6a0   : > { %v842_v4 = vpop.xlane.xlu2 %841 }
 0x6a1   : > { %v843_v46 = vmul.f32 %v842_v4, %v836_v40 }
 0x6a3   : > { %v844_v47 = vadd.f32 1e-05, %v843_v46 }
 0x6a5   : > { %1024 = vrsqrt.f32 %v844_v47  ;;  %vm851_vm11 = vweird.f32 %v844_v47 }
 0x6ab   : > { %v1025_v48 = vpop.eup %1024 }
 0x6ac   : > { %v846_v49 = vmul.f32 %v1025_v48, %v844_v47  ;;  %vm852_vm10 = vweird.f32 %v1025_v48 }
 0x6ad   : > { %vm853_vm12 = vmor %vm851_vm11, %vm852_vm10 }
 0x6ae   : > { %v847_v50 = vmul.f32 %v1025_v48, %v846_v49 }
 0x6b0   : > { %v848_v51 = vmul.f32 0.5, %v847_v50 }
 0x6b2   : > { %v849_v52 = vsub.f32 1.5, %v848_v51 }
 0x6b4   : > { %v850_v53 = vmul.f32 %v1025_v48, %v849_v52 }
 0x6b6   : > { %v854_v55 = vsel %vm853_vm12, %v1025_v48, %v850_v53 }
 0x6b7   : > { %v855_v57 = vmul.f32 %v854_v55, %v838_v43 }
 0x6b9   : > { %v860_v58 = vmul.f32 %v1004_v54, %v855_v57 }
 0x6bb   : > { %v865_v59 = vadd.f32 %v1005_v56, %v860_v58 }
 0x6bd   : > { %866 = vst.msk [vmem:[%s402_s23] sm:$0xff] %vm412_vm0, %v865_v59 }
 0x6be PF: > { %s20_s12 = sadd.s32 1, %s1032_s12  }
 0x6bf   : > { %p17_p4 = scmp.ge.s32.totalorder %s20_s12, 4  }
 0x6c1   :  { %19 = sbr.rel (!%p17_p4) target bundleno = 1 (0x1), region = 99 }

// kernel: decoder_forward.8
= control target key start
LH: loop header
LB: loop body
LE: loop exit
PB: predicated region body
PF: predicated region fallthrough
CT: control target
= control target key end

     0   :  { %s1143_s13 = smov 0   ;;  %s1279_s0 = inlined_call_operand.vmem [shape: f32[2,8,32], index: 0, kind: input, shape index: {}]   ;;  %s1280_s1 = inlined_call_operand.vmem [shape: f32[2,8,32], index: 1, kind: input, shape index: {}]   ;;  %s1281_s2 = inlined_call_operand.vmem [shape: f32[2,8,1], index: 2, kind: input, shape index: {}]   ;;  %s1282_s3 = inlined_call_operand.vmem [shape: f32[2,1,8], index: 3, kind: input, shape index: {}]   ;;  %s1283_s4 = inlined_call_operand.vmem [shape: f32[32,96], index: 4, kind: input, shape index: {}]   ;;  %s1284_s5 = inlined_call_operand.vmem [shape: f32[1,96], index: 5, kind: input, shape index: {}]   ;;  %s1285_s6 = inlined_call_operand.vmem [shape: f32[32,32], index: 6, kind: input, shape index: {}]   ;;  %s1286_s7 = inlined_call_operand.vmem [shape: f32[1,32], index: 7, kind: input, shape index: {}]   ;;  %s1287_s8 = inlined_call_operand.vmem [shape: f32[1,32], index: 8, kind: input, shape index: {}]   ;;  %s1288_s9 = inlined_call_operand.vmem [shape: f32[1,32], index: 9, kind: input, shape index: {}]   ;;  %s1289_s10 = inlined_call_operand.vmem [shape: f32[2,8,32], index: 10, kind: output, shape index: {}]  }
   0x1 LB: > { %s989_s14 = sadd.s32 4294967295, %s1077_s13   ;;  %p993_p0 = scmp.ge.s32.totalorder %s1077_s13, 1  ;;  %s1077_s13 = sphi %s1143_s13, %s20_s13  }
   0x2   : > { %p337_p1 = scmp.lt.s32.totalorder %s1077_s13, 3 }
   0x4   : > { %p338_p2 = pnand %p993_p0, %p337_p1 }
   0x5   : > { %s1079_s19 = smov (!%p338_p2), 96   ;;  %p384_p3 = scmp.lt.s32.totalorder (!%p338_p2), %s989_s14, 1 }
   0x6   : > { %341 = sbr.rel (%p338_p2) target bundleno = 1736 (0x6c8), region = 60  ;;  %s1081_s18 = smov (!%p338_p2), 120  }
   0x7   : > { %s1082_s20 = smov (!%p338_p2), 104   ;;  %s1083_s21 = smov (!%p338_p2), 112  }
   0x8   : > { %s1086_s28 = smov (!%p338_p2), 72  }
   0xb   : > { %v407_v0 = vld [vmem:[%s1283_s4 + $0x10] sm:$0xff]  ;;  %v408_v1 = vld [vmem:[%s1283_s4 + $0x18] sm:$0xff]  ;;  %v405_v3 = vld [vmem:[%s1283_s4] sm:$0xff]  ;;  %s1293_s14 = smov (!%p384_p3, %s989_s14), 1  ;;  %vm413_vm0 = vcmask 261120   ;;  %v1080_v8 = vmov 0  }
   0xc   : > { %v1035_v2 = vpack.i.bf16 %v407_v0, %v408_v1  ;;  %429 = vmatpush.msra.mxu0 %v408_v1  ;;  %v406_v4 = vld [vmem:[%s1283_s4 + $0x8] sm:$0xff]  ;;  %s1168_s24 = sshll.u32 %s1293_s14, 3  ;;  %v1047_v7 = vld [vmem:[%s1284_s5] ss:$0 sm:$0xff]  ;;  %1045 = vset.pattern.permute.xlu1 %v1080_v8  ;;  %vm492_vm2 = vcmask 64512   ;;  %s398_s26 = scalar_lea.vmem %s1282_s3, %s1293_s14 }
   0xd   : > { %v1040_v5 = vpack.i.bf16 %v405_v3, %v406_v4  ;;  %s387_s27 = scalar_lea.vmem %s1279_s0, %s1168_s24  ;;  %s395_s30 = scalar_lea.vmem %s1281_s2, %s1168_s24  ;;  %453 = vrot.lane.b32.xlu1 %v1047_v7, %s1079_s19  ;;  %1046 = vset.pattern.permute.xlu0 %v1080_v8  ;;  %v558_v23 = vld [vmem:[%s1285_s6] sm:$0xff] }
   0xe   : > { %1036 = vrot.lane.b32.xlu0 %v1035_v2, %s1079_s19  ;;  %430 = vmatpush.msra.mxu0 %v407_v0  ;;  %v1178_v6 = vld [vmem:[%s387_s27] sm:$0xff]  ;;  %s391_s17 = scalar_lea.vmem %s1280_s1, %s1168_s24  ;;  %s1084_s14 = smov 88  }
   0xf   : > { %v479_v9 = vld [vmem:[%s395_s30] sm:$0xff]  ;;  %s1085_s27 = smov 80  }
  0x10   : > { %431 = vmatpush.msra.mxu0 %v406_v4  ;;  %vm481_vm1 = vcmp.gt.f32.partialorder %v479_v9, 0.5  ;;  %v404_v17 = vld [vmem:[%s391_s17] sm:$0xff] }
  0x11   : > { %v483_v10 = vsel %vm481_vm1, 1, %v1080_v8  ;;  %v480_v27 = vld [vmem:[%s398_s26] sm:$0x1]  ;;  %s402_s26 = scalar_lea.vmem %s1289_s10, %s1168_s24 }
  0x12   : > { %432 = vmatpush.msra.mxu0 %v405_v3  ;;  %vm482_vm3 = vcmp.gt.f32.partialorder %v480_v27, 0.5 }
  0x13   : > { %998 = vmatmul.msk.f32.vlgmr.msra.gmra.mxu0 %vm413_vm0, %v1178_v6  ;;  %v488_v29 = vsel %vm482_vm3, 1, %v1080_v8 }
  0x14   : > { %v489_v30 = vperm.slane %v488_v29, 0 }
  0x15   : > { %485 = vperm.xlu1 %1045, %v483_v10  }
  0x16   : > { %1041 = vrot.lane.b32.xlu0 %v1040_v5, %s1079_s19  ;;  %vm490_vm4 = vcmp.eq.s32.totalorder %v489_v30, 1  ;;  %v832_v30 = vld [vmem:[%s1285_s6 + $0x18] sm:$0xff] }
  0x7f   : > { %v454_v18 = vpop.permute.xlu1 %453 }
  0x80   : > { %v1037_v11 = vpop.permute.xlu0 %1036 }
  0x81   : > { %v1038_v12 = vunpack.i.l.bf16 %v1037_v11  ;;  %v1039_v13 = vunpack.i.h.bf16 %v1037_v11 }
  0x83   : > { %471 = vmatpush.msra.mxu1 %v1038_v12 }
  0x85   : > { %472 = vmatpush.msra.mxu1 %v1039_v13 }
  0x87   : > { %v486_v24 = vpop.permute.xlu1 %485 }
  0x88   : > { %v1042_v14 = vpop.permute.xlu0 %1041  ;;  %vm487_vm5 = vcmp.eq.s32.totalorder %v486_v24, 1 }
  0x89   : > { %v1043_v15 = vunpack.i.l.bf16 %v1042_v14  ;;  %v1044_v16 = vunpack.i.h.bf16 %v1042_v14  ;;  %vm1211_vm6 = vmand %vm487_vm5, %vm490_vm4 }
  0x8b   : > { %473 = vmatpush.msra.mxu1 %v1043_v15 }
  0x8d   : > { %474 = vmatpush.msra.mxu1 %v1044_v16 }
  0x8e   : > { %999 = vmatmul.msk.f32.vlgmr.msra.gmra.mxu1 %vm413_vm0, %v404_v17 }
  0x8f   : > { %668 = vmatpush.msrb.mxu1 %v558_v23  ;;  %v626_v23 = vld [vmem:[%s1285_s6 + $0x8] sm:$0xff] }
  0x90   : > { %v434_v20 = vpop.f32.mrf.mxu0  ;;  %645 = vmatpush.msrb.mxu0 %v626_v23 }
  0x91   : > { %v435_v22 = vadd.f32 %v1047_v7, %v434_v20 }
 0x10b   : > { %v476_v19 = vpop.f32.mrf.mxu1 }
 0x10c   : > { %v1191_v21 = vadd.f32 %v476_v19, %v454_v18 }
 0x10e   : > { %561 = vrot.lane.b32.xlu1 %v1191_v21, %s1081_s18  ;;  %532 = vrot.lane.b32.xlu0 %v1191_v21, %s1079_s19 }
 0x10f   : > { %1000 = vmatpush.xpose.msk.msra.mxu2 %vm492_vm2, %v1191_v21 }
 0x112   : > { %1001 = vmatmul.msk.f32.vlgmr.msra.gmra.mxu2 %vm492_vm2, %v435_v22 }
 0x116   : > { %767 = vrot.lane.b32.xlu1 %v1191_v21, %s1082_s20  ;;  %675 = vrot.lane.b32.xlu0 %v1191_v21, %s1083_s21 }
 0x11e   : > { %765 = vrot.lane.b32.xlu1 %v435_v22, %s1082_s20  ;;  %673 = vrot.lane.b32.xlu0 %v435_v22, %s1083_s21 }
 0x180   : > { %v562_v25 = vpop.permute.xlu1 %561  ;;  %v533_v26 = vpop.permute.xlu0 %532 }
 0x181   : > { %553 = vmatpush.msra.mxu3 %v533_v26 }
 0x183   : > { %1003 = vmatpush.xpose.msk.msrb.mxu3 %vm492_vm2, %v562_v25  ;;  %v740_v25 = vld [vmem:[%s1285_s6 + $0x10] sm:$0xff] }
 0x184   : > { %759 = vmatpush.msra.mxu0 %v740_v25 }
 0x188   : > { %v768_v28 = vpop.permute.xlu1 %767  ;;  %v676_v44 = vpop.permute.xlu0 %675 }
 0x189   : > { %1012 = vmatpush.xpose.msk.msra.mxu1 %vm492_vm2, %v768_v28 }
 0x190   : > { %v674_v46 = vpop.permute.xlu0 %673  ;;  %v766_v48 = vpop.permute.xlu1 %765 }
 0x195   : > { %v516_v32 = vpop.f32.mrf.mxu2 }
 0x196   : > { %v519_v33 = vmul.f32 0.35355338, %v516_v32 }
 0x198   : > { %v520_v34 = vsel %vm1211_vm6, %v519_v33, -1e+10 }
 0x199   : > { %v521_v35 = vsel %vm492_vm2, %v520_v34, -inf }
 0x19a   : > { %522 = vmax.xlane.f32.xlu2 %v521_v35 }
 0x20d   : > { %v523_v36 = vpop.xlane.xlu2 %522 }
 0x20e   : > { %v524_v37 = vsub.f32 %v520_v34, %v523_v36  ;;  %v1048_v36 = vld [vmem:[%s1286_s7] ss:$0 sm:$0xff] }
 0x210   : > { %v525_v38 = vmul.f32 1.442695, %v524_v37 }
 0x212   : > { %1051 = vpow2.f32 %v525_v38 }
 0x218   : > { %v1052_v39 = vpop.eup %1051 }
 0x219   : > { %v527_v40 = vsel %vm492_vm2, %v1052_v39, 0.0 }
 0x21a   : > { %528 = vadd.xlane.f32.xlu2 %v527_v40 }
 0x232   : > { %559 = vrot.lane.b32.xlu2 %v435_v22, %s1081_s18 }
 0x28d   : > { %v529_v41 = vpop.xlane.xlu2 %528 }
 0x28e   : > { %1053 = vrcp.f32 %v529_v41 }
 0x294   : > { %v1054_v42 = vpop.eup %1053 }
 0x295   : > { %v531_v43 = vmul.f32 %v1054_v42, %v1052_v39  ;;  %v560_v45 = vpop.permute.xlu2 %559  ;;  %v1087_v42 = vmov 32.0  }
 0x297   : > { %1002 = vmatmul.msk.f32.vlgmr.msra.gmra.mxu3 %vm492_vm2, %v531_v43 }
 0x298   : > { %1008 = vmatpush.xpose.msk.msra.mxu3 %vm492_vm2, %v676_v44 }
 0x29f   : > { %1004 = vmatmul.msk.f32.vlgmr.msrb.gmra.mxu3 %vm492_vm2, %v560_v45 }
 0x2a7   : > { %1009 = vmatmul.msk.f32.vlgmr.msra.gmra.mxu3 %vm492_vm2, %v674_v46 }
 0x31a   : > { %v555_v47 = vpop.f32.mrf.mxu3 }
 0x31b   : > { %1007 = vmatmul.msk.f32.vlgmr.msrb.gmra.mxu1 %vm492_vm2, %v555_v47 }
 0x322   : > { %v584_v49 = vpop.f32.mrf.mxu3 }
 0x323   : > { %v587_v50 = vmul.f32 0.35355338, %v584_v49  ;;  %1013 = vmatmul.msk.f32.vlgmr.msra.gmra.mxu1 %vm492_vm2, %v766_v48 }
 0x325   : > { %v588_v51 = vsel %vm1211_vm6, %v587_v50, -1e+10 }
 0x326   : > { %v589_v52 = vsel %vm492_vm2, %v588_v51, -inf }
 0x327   : > { %590 = vmax.xlane.f32.xlu0 %v589_v52 }
 0x32a   : > { %v698_v53 = vpop.f32.mrf.mxu3 }
 0x32b   : > { %v701_v54 = vmul.f32 0.35355338, %v698_v53 }
 0x32d   : > { %v702_v55 = vsel %vm1211_vm6, %v701_v54, -1e+10 }
 0x32e   : > { %v703_v56 = vsel %vm492_vm2, %v702_v55, -inf }
 0x32f   : > { %704 = vmax.xlane.f32.xlu2 %v703_v56 }
 0x398   : > { %v1232_v57 = vpop.f32.mrf.mxu1 }
 0x39a   : > { %v591_v58 = vpop.xlane.xlu0 %590 }
 0x39b   : > { %v592_v59 = vsub.f32 %v588_v51, %v591_v58 }
 0x39d   : > { %v593_v60 = vmul.f32 1.442695, %v592_v59 }
 0x39f   : > { %1055 = vpow2.f32 %v593_v60 }
 0x3a0   : > { %v790_v61 = vpop.f32.mrf.mxu1 }
 0x3a1   : > { %v793_v62 = vmul.f32 0.35355338, %v790_v61 }
 0x3a2   : > { %v705_v63 = vpop.xlane.xlu2 %704 }
 0x3a3   : > { %v706_v0 = vsub.f32 %v702_v55, %v705_v63  ;;  %v794_v1 = vsel %vm1211_vm6, %v793_v62, -1e+10  ;;  %v1049_v62 = vld [vmem:[%s1287_s8] ss:$0 sm:$0xff] }
 0x3a4   : > { %v795_v2 = vsel %vm492_vm2, %v794_v1, -inf }
 0x3a5   : > { %v1056_v3 = vpop.eup %1055  ;;  %v707_v4 = vmul.f32 1.442695, %v706_v0  ;;  %796 = vmax.xlane.f32.xlu1 %v795_v2  ;;  %v1050_v0 = vld [vmem:[%s1288_s9] ss:$0 sm:$0xff] }
 0x3a6   : > { %v595_v5 = vsel %vm492_vm2, %v1056_v3, 0.0 }
 0x3a7   : > { %1057 = vpow2.f32 %v707_v4  ;;  %596 = vadd.xlane.f32.xlu2 %v595_v5 }
 0x3ad   : > { %v1058_v7 = vpop.eup %1057 }
 0x3ae   : > { %v709_v8 = vsel %vm492_vm2, %v1058_v7, 0.0 }
 0x3af   : > { %710 = vadd.xlane.f32.xlu1 %v709_v8 }
 0x3bf   : > { %600 = vrot.lane.b32.xlu2 %v1191_v21, %s1084_s14 }
 0x3c8   : > { %714 = vrot.lane.b32.xlu1 %v1191_v21, %s1085_s27 }
 0x418   : > { %v797_v9 = vpop.xlane.xlu1 %796 }
 0x419   : > { %v798_v10 = vsub.f32 %v794_v1, %v797_v9 }
 0x41a   : > { %v597_v11 = vpop.xlane.xlu2 %596 }
 0x41b   : > { %v799_v12 = vmul.f32 1.442695, %v798_v10  ;;  %1059 = vrcp.f32 %v597_v11 }
 0x41d   : > { %1061 = vpow2.f32 %v799_v12 }
 0x421   : > { %v1060_v13 = vpop.eup %1059 }
 0x422   : > { %v601_v14 = vpop.permute.xlu2 %600  ;;  %v599_v15 = vmul.f32 %v1060_v13, %v1056_v3  ;;  %v711_v18 = vpop.xlane.xlu1 %710 }
 0x423   : > { %v1062_v16 = vpop.eup %1061  ;;  %621 = vmatpush.msrb.mxu2 %v601_v14  ;;  %1063 = vrcp.f32 %v711_v18 }
 0x424   : > { %1005 = vmatmul.msk.f32.vlgmr.msrb.gmra.mxu2 %vm492_vm2, %v599_v15  ;;  %v801_v17 = vsel %vm492_vm2, %v1062_v16, 0.0 }
 0x425   : > { %802 = vadd.xlane.f32.xlu0 %v801_v17 }
 0x429   : > { %v1064_v19 = vpop.eup %1063 }
 0x42a   : > { %v713_v20 = vmul.f32 %v1064_v19, %v1058_v7 }
 0x439   : > { %806 = vrot.lane.b32.xlu0 %v1191_v21, %s1086_s28 }
 0x43a   : > { %v715_v22 = vpop.permute.xlu1 %714 }
 0x43b   : > { %735 = vmatpush.msra.mxu2 %v715_v22 }
 0x43c   : > { %1010 = vmatmul.msk.f32.vlgmr.msra.gmra.mxu2 %vm492_vm2, %v713_v20 }
 0x43d   : > { %851 = vmatpush.msrb.mxu2 %v832_v30 }
 0x498   : > { %v803_v24 = vpop.xlane.xlu0 %802 }
 0x499   : > { %1065 = vrcp.f32 %v803_v24 }
 0x49a   : > { %1067 = vrcp.f32 %v1087_v42 }
 0x49f   : > { %v1066_v27 = vpop.eup %1065 }
 0x4a0   : > { %v805_v21 = vmul.f32 %v1066_v27, %v1062_v16  ;;  %v1068_v43 = vpop.eup %1067 }
 0x4a1   : > { %v867_v44 = vmul.f32 32.0, %v1068_v43  ;;  %vm871_vm7 = vweird.f32 %v1068_v43 }
 0x4a3   : > { %v868_v45 = vsub.f32 1.0, %v867_v44 }
 0x4a5   : > { %v869_v46 = vmul.f32 %v1068_v43, %v868_v45 }
 0x4a7   : > { %v623_v26 = vpop.f32.mrf.mxu2  ;;  %v870_v47 = vadd.f32 %v1068_v43, %v869_v46 }
 0x4a8   : > { %1006 = vmatmul.msk.f32.vlgmr.msrb.gmra.mxu0 %vm492_vm2, %v623_v26 }
 0x4a9   : > { %v872_v48 = vsel %vm871_vm7, %v1068_v43, %v870_v47 }
 0x4ab   : > { %v807_v28 = vpop.permute.xlu0 %806 }
 0x4ac   : > { %827 = vmatpush.msrb.mxu3 %v807_v28 }
 0x4ad   : > { %1014 = vmatmul.msk.f32.vlgmr.msrb.gmra.mxu3 %vm492_vm2, %v805_v21 }
 0x4bf   : > { %v737_v29 = vpop.f32.mrf.mxu2 }
 0x4c0   : > { %1011 = vmatmul.msk.f32.vlgmr.msra.gmra.mxu0 %vm492_vm2, %v737_v29 }
 0x525   : > { %v647_v32 = vpop.f32.mrf.mxu0 }
 0x526   : > { %v671_v34 = vadd.f32 %v1232_v57, %v647_v32 }
 0x530   : > { %v829_v31 = vpop.f32.mrf.mxu3 }
 0x531   : > { %1015 = vmatmul.msk.f32.vlgmr.msrb.gmra.mxu2 %vm492_vm2, %v829_v31 }
 0x53d   : > { %v761_v33 = vpop.f32.mrf.mxu0 }
 0x53e   : > { %v764_v35 = vadd.f32 %v761_v33, %v671_v34 }
 0x5b4   : > { %v853_v37 = vpop.f32.mrf.mxu2 }
 0x5b5   : > { %v856_v38 = vadd.f32 %v853_v37, %v764_v35 }
 0x5b7   : > { %v861_v39 = vadd.f32 %v1048_v36, %v856_v38 }
 0x5b9   : > { %v862_v40 = vadd.f32 %v861_v39, %v1178_v6 }
 0x5bb   : > { %v863_v41 = vsel %vm413_vm0, %v862_v40, 0.0 }
 0x5bc   : > { %864 = vadd.xlane.f32.xlu0 %v863_v41 }
 0x62f   : > { %v865_v49 = vpop.xlane.xlu0 %864 }
 0x630   : > { %v873_v50 = vmul.f32 %v872_v48, %v865_v49 }
 0x632   : > { %v874_v51 = vsub.f32 %v862_v40, %v873_v50 }
 0x634   : > { %v875_v52 = vmul.f32 %v874_v51, %v874_v51 }
 0x636   : > { %v876_v53 = vsel %vm413_vm0, %v875_v52, 0.0 }
 0x637   : > { %877 = vadd.xlane.f32.xlu2 %v876_v53 }
 0x6aa   : > { %v878_v6 = vpop.xlane.xlu2 %877 }
 0x6ab   : > { %v879_v54 = vmul.f32 %v878_v6, %v872_v48 }
 0x6ad   : > { %v880_v55 = vadd.f32 1e-05, %v879_v54 }
 0x6af   : > { %1069 = vrsqrt.f32 %v880_v55  ;;  %vm887_vm9 = vweird.f32 %v880_v55 }
 0x6b5   : > { %v1070_v56 = vpop.eup %1069 }
 0x6b6   : > { %v882_v57 = vmul.f32 %v1070_v56, %v880_v55  ;;  %vm888_vm8 = vweird.f32 %v1070_v56 }
 0x6b7   : > { %vm889_vm10 = vmor %vm887_vm9, %vm888_vm8 }
 0x6b8   : > { %v883_v58 = vmul.f32 %v1070_v56, %v882_v57 }
 0x6ba   : > { %v884_v59 = vmul.f32 0.5, %v883_v58 }
 0x6bc   : > { %v885_v60 = vsub.f32 1.5, %v884_v59 }
 0x6be   : > { %v886_v61 = vmul.f32 %v1070_v56, %v885_v60 }
 0x6c0   : > { %v890_v63 = vsel %vm889_vm10, %v1070_v56, %v886_v61 }
 0x6c1   : > { %v891_v1 = vmul.f32 %v890_v63, %v874_v51 }
 0x6c3   : > { %v896_v2 = vmul.f32 %v1049_v62, %v891_v1 }
 0x6c5   : > { %v901_v3 = vadd.f32 %v1050_v0, %v896_v2 }
 0x6c7   : > { %902 = vst.msk [vmem:[%s402_s26] sm:$0xff] %vm413_vm0, %v901_v3 }
 0x6c8 PF: > { %s20_s13 = sadd.s32 1, %s1077_s13  }
 0x6c9   : > { %p17_p4 = scmp.ge.s32.totalorder %s20_s13, 4  }
 0x6cb   :  { %19 = sbr.rel (!%p17_p4) target bundleno = 1 (0x1), region = 99 }

</bundles_post_ra>
